<compile_context>
chip_gen: v7x
topology: tpu7x:2x2x1
jax: 0.10.0
libtpu: 0.0.40
codegen_flags: <defaults>
</compile_context>

<pallas_src>
import functools

import jax
import jax.numpy as jnp
from jax.experimental import pallas as pl
from jax.experimental.pallas import tpu as pltpu


# ----------------------------- Fused kernel ---------------------------------
def fused_jazz_lstm_kernel(tok_ref,                      # SMEM: [T*B] int32 (prefetch)
                           gxt_ref,                      # [vocab, 1, 4H] f32
                           whh_ref,                      # [H, 4H] bf16
                           wfc_ref,                      # [H, Vp] bf16
                           bfc_ref,                      # [1, Vp] f32
                           o_ref,                        # [T*Bp, Vp] f32
                           gx_scratch,                   # VMEM [T*Bp, 4H] f32
                           hs_scratch,                   # VMEM [T*Bp, H]  f32
                           *, T, B, B_pad):
    H = whh_ref.shape[0]

    # Zero the hoisted-projection scratch so padded batch rows stay finite
    # (their outputs are dropped in the wrapper; rows never mix in the LSTM).
    gx_scratch[...] = jnp.zeros_like(gx_scratch)

    # ---- Gather precomputed (emb @ W_ih^T + b) rows for the real tokens.
    #      Scalar token ids come from SMEM (scalar prefetch); each row is a
    #      dynamic leading-dim VMEM read.  Off the serial critical path. ----
    for t in range(T):
        for b in range(B):
            tok = tok_ref[t * B + b]                               # int32 scalar
            gx_scratch[pl.ds(t * B_pad + b, 1), :] = gxt_ref[tok]  # (1, 4H)

    # Hoist recurrent weight once (bf16, ~32 vregs).
    whh = whh_ref[...]

    def sigmoid(x):  # single EUP tanh instead of exp + divide
        return 0.5 * (jnp.tanh(0.5 * x) + 1.0)

    # ---- LSTM recurrence, statically unrolled over T.  Only h @ W_hh^T is on
    #      the serial chain; all scratch accesses are 8-sublane aligned. ----
    h = jnp.zeros((B_pad, H), jnp.float32)
    c = jnp.zeros((B_pad, H), jnp.float32)
    for t in range(T):
        gx_t = gx_scratch[pl.ds(t * B_pad, B_pad), :]              # (8, 4H) f32
        gates = gx_t + jnp.dot(h.astype(jnp.bfloat16), whh,
                               preferred_element_type=jnp.float32)  # (8, 4H) f32
        # PyTorch gate order: i, f, g, o
        i = sigmoid(gates[:, 0 * H:1 * H])
        f = sigmoid(gates[:, 1 * H:2 * H])
        g = jnp.tanh(gates[:, 2 * H:3 * H])
        o = sigmoid(gates[:, 3 * H:4 * H])
        c = f * c + i * g
        h = o * jnp.tanh(c)
        hs_scratch[pl.ds(t * B_pad, B_pad), :] = h                 # aligned store

    # ---- FC + log-softmax on the full [T*Bp, H] hidden block.  bf16 MXU
    #      operands, f32 accumulate; pad columns carry -1e30 bias so exp()
    #      underflows to exactly 0 and the real-column softmax is exact. ----
    z = (jnp.dot(hs_scratch[...].astype(jnp.bfloat16), wfc_ref[...],
                 preferred_element_type=jnp.float32) + bfc_ref[...])  # (T*Bp, Vp)
    m = jnp.max(z, axis=-1, keepdims=True)
    lse = m + jnp.log(jnp.sum(jnp.exp(z - m), axis=-1, keepdims=True))
    o_ref[...] = z - lse


def fused_forward(tok_flat, gx_table, whh_bf, wfc_bf, bfc, *, T, B, B_pad):
    vocab, _, H4 = gx_table.shape
    H = whh_bf.shape[0]
    Vp = wfc_bf.shape[1]
    TBp = T * B_pad
    kernel = functools.partial(fused_jazz_lstm_kernel, T=T, B=B, B_pad=B_pad)
    return pl.pallas_call(
        kernel,
        out_shape=jax.ShapeDtypeStruct((TBp, Vp), jnp.float32),
        grid_spec=pltpu.PrefetchScalarGridSpec(
            num_scalar_prefetch=1,                 # token ids -> SMEM
            grid=(1,),                             # single fused invocation
            in_specs=[
                pl.BlockSpec((vocab, 1, H4), lambda i, tok: (0, 0, 0)),  # gx_table
                pl.BlockSpec((H, H4), lambda i, tok: (0, 0)),            # W_hh^T bf16
                pl.BlockSpec((H, Vp), lambda i, tok: (0, 0)),            # fc.weight^T bf16 (padded)
                pl.BlockSpec((1, Vp), lambda i, tok: (0, 0)),            # fc.bias (padded, -1e30)
            ],
            out_specs=pl.BlockSpec((TBp, Vp), lambda i, tok: (0, 0)),
            scratch_shapes=[
                pltpu.VMEM((TBp, H4), jnp.float32),   # gathered input projection
                pltpu.VMEM((TBp, H), jnp.float32),    # hidden-state history
            ],
        ),
        compiler_params=pltpu.CompilerParams(
            dimension_semantics=("arbitrary",)),      # recurrence is sequential
    )(tok_flat, gx_table, whh_bf, wfc_bf, bfc)


# ------------------------------ Param prep -----------------------------------
def prepare_params(embedding, w_ih_t, w_hh_t, b, w_fc_t, b_fc, *, vpad):
    """Fold embedding + input projection, pad FC to 128 lanes, cast MXU weights
    to bf16.  Done once, outside the jitted forward."""
    vocab, _ = embedding.shape
    H = w_hh_t.shape[0]
    V = w_fc_t.shape[1]
    gx_table = (embedding @ w_ih_t + b).astype(jnp.float32).reshape(vocab, 1, 4 * H)
    w_fc_pad = jnp.zeros((H, vpad), jnp.float32).at[:, :V].set(w_fc_t)
    b_fc_pad = jnp.full((1, vpad), -1e30, jnp.float32).at[:, :V].set(b_fc)
    return {
        "gx_table": gx_table,                          # [vocab, 1, 4H] f32
        "w_hh_bf16": w_hh_t.astype(jnp.bfloat16),      # [H, 4H] bf16
        "w_fc_bf16": w_fc_pad.astype(jnp.bfloat16),    # [H, Vp] bf16
        "b_fc_pad": b_fc_pad,                          # [1, Vp] f32
    }


# ------------------------------ Full forward --------------------------------
@functools.partial(jax.jit, static_argnames=("output_size",))
def jazz_melody_lstm_forward(tokens, params, *, output_size):
    B, T = tokens.shape
    B_pad = max(8, ((B + 7) // 8) * 8)                 # f32 sublane-aligned batch
    # time-major flat token ids: index = t*B + b  (tiny int glue op)
    tok_flat = tokens.astype(jnp.int32).T.reshape(T * B)
    logp = fused_forward(tok_flat, params["gx_table"], params["w_hh_bf16"],
                         params["w_fc_bf16"], params["b_fc_pad"],
                         T=T, B=B, B_pad=B_pad)
    # drop batch / lane padding and reorder the tiny logits back to [B, T, V]
    logp = logp.reshape(T, B_pad, -1)[:, :B, :output_size]
    return logp.transpose(1, 0, 2)


# ------------------------- Pure-JAX reference (check) -----------------------
def reference_forward(tokens, embedding, w_ih_t, w_hh_t, b, w_fc_t, b_fc):
    emb = embedding[tokens]                                # [B, T, E]
    Bb, _, _ = emb.shape
    H = w_hh_t.shape[0]
    x_tbe = jnp.transpose(emb, (1, 0, 2))                  # [T, B, E]

    def step(carry, x_t):
        h, c = carry
        gates = x_t @ w_ih_t + h @ w_hh_t + b
        i = jax.nn.sigmoid(gates[:, :H])
        f = jax.nn.sigmoid(gates[:, H:2 * H])
        g = jnp.tanh(gates[:, 2 * H:3 * H])
        o = jax.nn.sigmoid(gates[:, 3 * H:])
        c = f * c + i * g
        h = o * jnp.tanh(c)
        return (h, c), h

    init = (jnp.zeros((Bb, H), jnp.float32), jnp.zeros((Bb, H), jnp.float32))
    _, hs = jax.lax.scan(step, init, x_tbe)                # [T, B, H]
    z = jnp.transpose(hs, (1, 0, 2)) @ w_fc_t + b_fc       # [B, T, V]
    return jax.nn.log_softmax(z, axis=2)


if __name__ == "__main__":
    vocab_size, output_size = 10, 12
    embedding_dim, hidden_dim = 32, 128
    B, T = 2, 8
    VPAD = ((output_size + 127) // 128) * 128              # lane-dense FC output

    key = jax.random.PRNGKey(0)
    ks = jax.random.split(key, 8)

    # PyTorch-layout params, pre-transposed for matmul.
    embedding = 0.1 * jax.random.normal(ks[0], (vocab_size, embedding_dim), jnp.float32)
    w_ih_t = 0.05 * jax.random.normal(ks[1], (embedding_dim, 4 * hidden_dim), jnp.float32)
    w_hh_t = 0.05 * jax.random.normal(ks[2], (hidden_dim, 4 * hidden_dim), jnp.float32)
    b = 0.05 * jax.random.normal(ks[3], (1, 4 * hidden_dim), jnp.float32)   # b_ih + b_hh
    w_fc_t = 0.05 * jax.random.normal(ks[4], (hidden_dim, output_size), jnp.float32)
    b_fc = 0.05 * jax.random.normal(ks[5], (1, output_size), jnp.float32)

    params = prepare_params(embedding, w_ih_t, w_hh_t, b, w_fc_t, b_fc, vpad=VPAD)

    tokens = jax.random.randint(ks[6], (B, T), 0, vocab_size, dtype=jnp.int32)

    out = jazz_melody_lstm_forward(tokens, params, output_size=output_size)
    out = jax.block_until_ready(out)

    assert out.shape == (B, T, output_size), out.shape
    assert out.dtype == jnp.float32
    # log-softmax rows must (numerically) sum to 1 in prob space
    assert bool(jnp.all(jnp.abs(jnp.sum(jnp.exp(out), axis=-1) - 1.0) < 1e-4))

    # Compare against a pure-JAX f32 reference of the same module.
    ref = reference_forward(tokens, embedding, w_ih_t, w_hh_t, b, w_fc_t, b_fc)
    max_err = float(jnp.max(jnp.abs(out - ref)))
    assert max_err < 2e-2, max_err

    print("KERNEL_OK")
</pallas_src>

<mosaic_0001>
module attributes {stable_mosaic.version = 11 : i64} {
  func.func @fused_jazz_lstm_kernel(%arg0: i32, %arg1: memref<16xi32, #tpu.memory_space<smem>>, %arg2: memref<10x1x512xf32, #tpu.memory_space<vmem>>, %arg3: memref<128x512xbf16, #tpu.memory_space<vmem>>, %arg4: memref<128x128xbf16, #tpu.memory_space<vmem>>, %arg5: memref<1x128xf32, #tpu.memory_space<vmem>>, %arg6: memref<64x128xf32, #tpu.memory_space<vmem>>, %arg7: memref<64x512xf32, #tpu.memory_space<vmem>>, %arg8: memref<64x128xf32, #tpu.memory_space<vmem>>) attributes {dimension_semantics = [#tpu.dimension_semantics<arbitrary>], iteration_bounds = array<i64: 1>, scalar_prefetch = 1 : i64, scratch_operands = 2 : i64, tpu.core_type = #tpu.core_type<tc>, window_params = [{pipeline_mode = #tpu.pipeline_mode<synchronous>, transform_indices = @transform_0, window_bounds = array<i64: 10, 1, 512>}, {pipeline_mode = #tpu.pipeline_mode<synchronous>, transform_indices = @transform_1, window_bounds = array<i64: 128, 512>}, {pipeline_mode = #tpu.pipeline_mode<synchronous>, transform_indices = @transform_2, window_bounds = array<i64: 128, 128>}, {pipeline_mode = #tpu.pipeline_mode<synchronous>, transform_indices = @transform_3, window_bounds = array<i64: 1, 128>}, {pipeline_mode = #tpu.pipeline_mode<synchronous>, transform_indices = @transform_4, window_bounds = array<i64: 64, 128>}]} {
    %cst = arith.constant 0.000000e+00 : f32
    %0 = vector.broadcast %cst : f32 to vector<64x512xf32>
    %c0 = arith.constant 0 : index
    %c0_0 = arith.constant 0 : index
    %1 = vector.load %arg7[%c0, %c0_0] : memref<64x512xf32, #tpu.memory_space<vmem>>, vector<64x512xf32>
    tpu.vector_store %arg7[%c0, %c0_0], %0 {strides = array<i32>} : memref<64x512xf32, #tpu.memory_space<vmem>>, vector<64x512xf32>,
    %c0_1 = arith.constant 0 : index
    %2 = memref.load %arg1[%c0_1] : memref<16xi32, #tpu.memory_space<smem>>
    %3 = arith.index_cast %2 : i32 to index
    %c0_2 = arith.constant 0 : index
    %c0_3 = arith.constant 0 : index
    %4 = vector.load %arg2[%3, %c0_2, %c0_3] : memref<10x1x512xf32, #tpu.memory_space<vmem>>, vector<1x1x512xf32>
    %5 = vector.shape_cast %4 : vector<1x1x512xf32> to vector<1x512xf32>
    %c0_4 = arith.constant 0 : index
    %c0_5 = arith.constant 0 : index
    %6 = vector.load %arg7[%c0_4, %c0_5] : memref<64x512xf32, #tpu.memory_space<vmem>>, vector<1x512xf32>
    tpu.vector_store %arg7[%c0_4, %c0_5], %5 {strides = array<i32>} : memref<64x512xf32, #tpu.memory_space<vmem>>, vector<1x512xf32>,
    %c1 = arith.constant 1 : index
    %7 = memref.load %arg1[%c1] : memref<16xi32, #tpu.memory_space<smem>>
    %8 = arith.index_cast %7 : i32 to index
    %c0_6 = arith.constant 0 : index
    %c0_7 = arith.constant 0 : index
    %9 = vector.load %arg2[%8, %c0_6, %c0_7] : memref<10x1x512xf32, #tpu.memory_space<vmem>>, vector<1x1x512xf32>
    %10 = vector.shape_cast %9 : vector<1x1x512xf32> to vector<1x512xf32>
    %c1_8 = arith.constant 1 : index
    %c0_9 = arith.constant 0 : index
    %11 = vector.load %arg7[%c1_8, %c0_9] : memref<64x512xf32, #tpu.memory_space<vmem>>, vector<1x512xf32>
    tpu.vector_store %arg7[%c1_8, %c0_9], %10 {strides = array<i32>} : memref<64x512xf32, #tpu.memory_space<vmem>>, vector<1x512xf32>,
    %c2 = arith.constant 2 : index
    %12 = memref.load %arg1[%c2] : memref<16xi32, #tpu.memory_space<smem>>
    %13 = arith.index_cast %12 : i32 to index
    %c0_10 = arith.constant 0 : index
    %c0_11 = arith.constant 0 : index
    %14 = vector.load %arg2[%13, %c0_10, %c0_11] : memref<10x1x512xf32, #tpu.memory_space<vmem>>, vector<1x1x512xf32>
    %15 = vector.shape_cast %14 : vector<1x1x512xf32> to vector<1x512xf32>
    %c8 = arith.constant 8 : index
    %c0_12 = arith.constant 0 : index
    %16 = vector.load %arg7[%c8, %c0_12] : memref<64x512xf32, #tpu.memory_space<vmem>>, vector<1x512xf32>
    tpu.vector_store %arg7[%c8, %c0_12], %15 {strides = array<i32>} : memref<64x512xf32, #tpu.memory_space<vmem>>, vector<1x512xf32>,
    %c3 = arith.constant 3 : index
    %17 = memref.load %arg1[%c3] : memref<16xi32, #tpu.memory_space<smem>>
    %18 = arith.index_cast %17 : i32 to index
    %c0_13 = arith.constant 0 : index
    %c0_14 = arith.constant 0 : index
    %19 = vector.load %arg2[%18, %c0_13, %c0_14] : memref<10x1x512xf32, #tpu.memory_space<vmem>>, vector<1x1x512xf32>
    %20 = vector.shape_cast %19 : vector<1x1x512xf32> to vector<1x512xf32>
    %c9 = arith.constant 9 : index
    %c0_15 = arith.constant 0 : index
    %21 = vector.load %arg7[%c9, %c0_15] : memref<64x512xf32, #tpu.memory_space<vmem>>, vector<1x512xf32>
    tpu.vector_store %arg7[%c9, %c0_15], %20 {strides = array<i32>} : memref<64x512xf32, #tpu.memory_space<vmem>>, vector<1x512xf32>,
    %c4 = arith.constant 4 : index
    %22 = memref.load %arg1[%c4] : memref<16xi32, #tpu.memory_space<smem>>
    %23 = arith.index_cast %22 : i32 to index
    %c0_16 = arith.constant 0 : index
    %c0_17 = arith.constant 0 : index
    %24 = vector.load %arg2[%23, %c0_16, %c0_17] : memref<10x1x512xf32, #tpu.memory_space<vmem>>, vector<1x1x512xf32>
    %25 = vector.shape_cast %24 : vector<1x1x512xf32> to vector<1x512xf32>
    %c16 = arith.constant 16 : index
    %c0_18 = arith.constant 0 : index
    %26 = vector.load %arg7[%c16, %c0_18] : memref<64x512xf32, #tpu.memory_space<vmem>>, vector<1x512xf32>
    tpu.vector_store %arg7[%c16, %c0_18], %25 {strides = array<i32>} : memref<64x512xf32, #tpu.memory_space<vmem>>, vector<1x512xf32>,
    %c5 = arith.constant 5 : index
    %27 = memref.load %arg1[%c5] : memref<16xi32, #tpu.memory_space<smem>>
    %28 = arith.index_cast %27 : i32 to index
    %c0_19 = arith.constant 0 : index
    %c0_20 = arith.constant 0 : index
    %29 = vector.load %arg2[%28, %c0_19, %c0_20] : memref<10x1x512xf32, #tpu.memory_space<vmem>>, vector<1x1x512xf32>
    %30 = vector.shape_cast %29 : vector<1x1x512xf32> to vector<1x512xf32>
    %c17 = arith.constant 17 : index
    %c0_21 = arith.constant 0 : index
    %31 = vector.load %arg7[%c17, %c0_21] : memref<64x512xf32, #tpu.memory_space<vmem>>, vector<1x512xf32>
    tpu.vector_store %arg7[%c17, %c0_21], %30 {strides = array<i32>} : memref<64x512xf32, #tpu.memory_space<vmem>>, vector<1x512xf32>,
    %c6 = arith.constant 6 : index
    %32 = memref.load %arg1[%c6] : memref<16xi32, #tpu.memory_space<smem>>
    %33 = arith.index_cast %32 : i32 to index
    %c0_22 = arith.constant 0 : index
    %c0_23 = arith.constant 0 : index
    %34 = vector.load %arg2[%33, %c0_22, %c0_23] : memref<10x1x512xf32, #tpu.memory_space<vmem>>, vector<1x1x512xf32>
    %35 = vector.shape_cast %34 : vector<1x1x512xf32> to vector<1x512xf32>
    %c24 = arith.constant 24 : index
    %c0_24 = arith.constant 0 : index
    %36 = vector.load %arg7[%c24, %c0_24] : memref<64x512xf32, #tpu.memory_space<vmem>>, vector<1x512xf32>
    tpu.vector_store %arg7[%c24, %c0_24], %35 {strides = array<i32>} : memref<64x512xf32, #tpu.memory_space<vmem>>, vector<1x512xf32>,
    %c7 = arith.constant 7 : index
    %37 = memref.load %arg1[%c7] : memref<16xi32, #tpu.memory_space<smem>>
    %38 = arith.index_cast %37 : i32 to index
    %c0_25 = arith.constant 0 : index
    %c0_26 = arith.constant 0 : index
    %39 = vector.load %arg2[%38, %c0_25, %c0_26] : memref<10x1x512xf32, #tpu.memory_space<vmem>>, vector<1x1x512xf32>
    %40 = vector.shape_cast %39 : vector<1x1x512xf32> to vector<1x512xf32>
    %c25 = arith.constant 25 : index
    %c0_27 = arith.constant 0 : index
    %41 = vector.load %arg7[%c25, %c0_27] : memref<64x512xf32, #tpu.memory_space<vmem>>, vector<1x512xf32>
    tpu.vector_store %arg7[%c25, %c0_27], %40 {strides = array<i32>} : memref<64x512xf32, #tpu.memory_space<vmem>>, vector<1x512xf32>,
    %c8_28 = arith.constant 8 : index
    %42 = memref.load %arg1[%c8_28] : memref<16xi32, #tpu.memory_space<smem>>
    %43 = arith.index_cast %42 : i32 to index
    %c0_29 = arith.constant 0 : index
    %c0_30 = arith.constant 0 : index
    %44 = vector.load %arg2[%43, %c0_29, %c0_30] : memref<10x1x512xf32, #tpu.memory_space<vmem>>, vector<1x1x512xf32>
    %45 = vector.shape_cast %44 : vector<1x1x512xf32> to vector<1x512xf32>
    %c32 = arith.constant 32 : index
    %c0_31 = arith.constant 0 : index
    %46 = vector.load %arg7[%c32, %c0_31] : memref<64x512xf32, #tpu.memory_space<vmem>>, vector<1x512xf32>
    tpu.vector_store %arg7[%c32, %c0_31], %45 {strides = array<i32>} : memref<64x512xf32, #tpu.memory_space<vmem>>, vector<1x512xf32>,
    %c9_32 = arith.constant 9 : index
    %47 = memref.load %arg1[%c9_32] : memref<16xi32, #tpu.memory_space<smem>>
    %48 = arith.index_cast %47 : i32 to index
    %c0_33 = arith.constant 0 : index
    %c0_34 = arith.constant 0 : index
    %49 = vector.load %arg2[%48, %c0_33, %c0_34] : memref<10x1x512xf32, #tpu.memory_space<vmem>>, vector<1x1x512xf32>
    %50 = vector.shape_cast %49 : vector<1x1x512xf32> to vector<1x512xf32>
    %c33 = arith.constant 33 : index
    %c0_35 = arith.constant 0 : index
    %51 = vector.load %arg7[%c33, %c0_35] : memref<64x512xf32, #tpu.memory_space<vmem>>, vector<1x512xf32>
    tpu.vector_store %arg7[%c33, %c0_35], %50 {strides = array<i32>} : memref<64x512xf32, #tpu.memory_space<vmem>>, vector<1x512xf32>,
    %c10 = arith.constant 10 : index
    %52 = memref.load %arg1[%c10] : memref<16xi32, #tpu.memory_space<smem>>
    %53 = arith.index_cast %52 : i32 to index
    %c0_36 = arith.constant 0 : index
    %c0_37 = arith.constant 0 : index
    %54 = vector.load %arg2[%53, %c0_36, %c0_37] : memref<10x1x512xf32, #tpu.memory_space<vmem>>, vector<1x1x512xf32>
    %55 = vector.shape_cast %54 : vector<1x1x512xf32> to vector<1x512xf32>
    %c40 = arith.constant 40 : index
    %c0_38 = arith.constant 0 : index
    %56 = vector.load %arg7[%c40, %c0_38] : memref<64x512xf32, #tpu.memory_space<vmem>>, vector<1x512xf32>
    tpu.vector_store %arg7[%c40, %c0_38], %55 {strides = array<i32>} : memref<64x512xf32, #tpu.memory_space<vmem>>, vector<1x512xf32>,
    %c11 = arith.constant 11 : index
    %57 = memref.load %arg1[%c11] : memref<16xi32, #tpu.memory_space<smem>>
    %58 = arith.index_cast %57 : i32 to index
    %c0_39 = arith.constant 0 : index
    %c0_40 = arith.constant 0 : index
    %59 = vector.load %arg2[%58, %c0_39, %c0_40] : memref<10x1x512xf32, #tpu.memory_space<vmem>>, vector<1x1x512xf32>
    %60 = vector.shape_cast %59 : vector<1x1x512xf32> to vector<1x512xf32>
    %c41 = arith.constant 41 : index
    %c0_41 = arith.constant 0 : index
    %61 = vector.load %arg7[%c41, %c0_41] : memref<64x512xf32, #tpu.memory_space<vmem>>, vector<1x512xf32>
    tpu.vector_store %arg7[%c41, %c0_41], %60 {strides = array<i32>} : memref<64x512xf32, #tpu.memory_space<vmem>>, vector<1x512xf32>,
    %c12 = arith.constant 12 : index
    %62 = memref.load %arg1[%c12] : memref<16xi32, #tpu.memory_space<smem>>
    %63 = arith.index_cast %62 : i32 to index
    %c0_42 = arith.constant 0 : index
    %c0_43 = arith.constant 0 : index
    %64 = vector.load %arg2[%63, %c0_42, %c0_43] : memref<10x1x512xf32, #tpu.memory_space<vmem>>, vector<1x1x512xf32>
    %65 = vector.shape_cast %64 : vector<1x1x512xf32> to vector<1x512xf32>
    %c48 = arith.constant 48 : index
    %c0_44 = arith.constant 0 : index
    %66 = vector.load %arg7[%c48, %c0_44] : memref<64x512xf32, #tpu.memory_space<vmem>>, vector<1x512xf32>
    tpu.vector_store %arg7[%c48, %c0_44], %65 {strides = array<i32>} : memref<64x512xf32, #tpu.memory_space<vmem>>, vector<1x512xf32>,
    %c13 = arith.constant 13 : index
    %67 = memref.load %arg1[%c13] : memref<16xi32, #tpu.memory_space<smem>>
    %68 = arith.index_cast %67 : i32 to index
    %c0_45 = arith.constant 0 : index
    %c0_46 = arith.constant 0 : index
    %69 = vector.load %arg2[%68, %c0_45, %c0_46] : memref<10x1x512xf32, #tpu.memory_space<vmem>>, vector<1x1x512xf32>
    %70 = vector.shape_cast %69 : vector<1x1x512xf32> to vector<1x512xf32>
    %c49 = arith.constant 49 : index
    %c0_47 = arith.constant 0 : index
    %71 = vector.load %arg7[%c49, %c0_47] : memref<64x512xf32, #tpu.memory_space<vmem>>, vector<1x512xf32>
    tpu.vector_store %arg7[%c49, %c0_47], %70 {strides = array<i32>} : memref<64x512xf32, #tpu.memory_space<vmem>>, vector<1x512xf32>,
    %c14 = arith.constant 14 : index
    %72 = memref.load %arg1[%c14] : memref<16xi32, #tpu.memory_space<smem>>
    %73 = arith.index_cast %72 : i32 to index
    %c0_48 = arith.constant 0 : index
    %c0_49 = arith.constant 0 : index
    %74 = vector.load %arg2[%73, %c0_48, %c0_49] : memref<10x1x512xf32, #tpu.memory_space<vmem>>, vector<1x1x512xf32>
    %75 = vector.shape_cast %74 : vector<1x1x512xf32> to vector<1x512xf32>
    %c56 = arith.constant 56 : index
    %c0_50 = arith.constant 0 : index
    %76 = vector.load %arg7[%c56, %c0_50] : memref<64x512xf32, #tpu.memory_space<vmem>>, vector<1x512xf32>
    tpu.vector_store %arg7[%c56, %c0_50], %75 {strides = array<i32>} : memref<64x512xf32, #tpu.memory_space<vmem>>, vector<1x512xf32>,
    %c15 = arith.constant 15 : index
    %77 = memref.load %arg1[%c15] : memref<16xi32, #tpu.memory_space<smem>>
    %78 = arith.index_cast %77 : i32 to index
    %c0_51 = arith.constant 0 : index
    %c0_52 = arith.constant 0 : index
    %79 = vector.load %arg2[%78, %c0_51, %c0_52] : memref<10x1x512xf32, #tpu.memory_space<vmem>>, vector<1x1x512xf32>
    %80 = vector.shape_cast %79 : vector<1x1x512xf32> to vector<1x512xf32>
    %c57 = arith.constant 57 : index
    %c0_53 = arith.constant 0 : index
    %81 = vector.load %arg7[%c57, %c0_53] : memref<64x512xf32, #tpu.memory_space<vmem>>, vector<1x512xf32>
    tpu.vector_store %arg7[%c57, %c0_53], %80 {strides = array<i32>} : memref<64x512xf32, #tpu.memory_space<vmem>>, vector<1x512xf32>,
    %c0_54 = arith.constant 0 : index
    %c0_55 = arith.constant 0 : index
    %82 = vector.load %arg3[%c0_54, %c0_55] : memref<128x512xbf16, #tpu.memory_space<vmem>>, vector<128x512xbf16>
    %cst_56 = arith.constant 0.000000e+00 : f32
    %83 = vector.broadcast %cst_56 : f32 to vector<8x128xf32>
    %cst_57 = arith.constant 0.000000e+00 : f32
    %84 = vector.broadcast %cst_57 : f32 to vector<8x128xf32>
    %c0_58 = arith.constant 0 : index
    %c0_59 = arith.constant 0 : index
    %85 = vector.load %arg7[%c0_58, %c0_59] : memref<64x512xf32, #tpu.memory_space<vmem>>, vector<8x512xf32>
    %86 = arith.truncf %83 : vector<8x128xf32> to vector<8x128xbf16>
    %cst_60 = arith.constant dense<0.000000e+00> : vector<8x512xf32>
    %87 = tpu.matmul %86, %82, %cst_60 {dimension_numbers = #tpu.dot_dimension_numbers<[1], [0], [0], [1], [0, 0, 1, 1], [], []>} : vector<8x128xbf16>, vector<128x512xbf16>, vector<8x512xf32> -> vector<8x512xf32>
    %88 = arith.addf %85, %87 : vector<8x512xf32>
    %89 = vector.extract_strided_slice %88 {offsets = [0, 0], sizes = [8, 128], strides = [1, 1]} : vector<8x512xf32> to vector<8x128xf32>
    %cst_61 = arith.constant 5.000000e-01 : f32
    %90 = vector.broadcast %cst_61 : f32 to vector<8x128xf32>
    %91 = arith.mulf %90, %89 : vector<8x128xf32>
    %92 = math.tanh %91 : vector<8x128xf32>
    %cst_62 = arith.constant 1.000000e+00 : f32
    %93 = vector.broadcast %cst_62 : f32 to vector<8x128xf32>
    %94 = arith.addf %92, %93 : vector<8x128xf32>
    %cst_63 = arith.constant 5.000000e-01 : f32
    %95 = vector.broadcast %cst_63 : f32 to vector<8x128xf32>
    %96 = arith.mulf %95, %94 : vector<8x128xf32>
    %97 = vector.extract_strided_slice %88 {offsets = [0, 128], sizes = [8, 128], strides = [1, 1]} : vector<8x512xf32> to vector<8x128xf32>
    %cst_64 = arith.constant 5.000000e-01 : f32
    %98 = vector.broadcast %cst_64 : f32 to vector<8x128xf32>
    %99 = arith.mulf %98, %97 : vector<8x128xf32>
    %100 = math.tanh %99 : vector<8x128xf32>
    %cst_65 = arith.constant 1.000000e+00 : f32
    %101 = vector.broadcast %cst_65 : f32 to vector<8x128xf32>
    %102 = arith.addf %100, %101 : vector<8x128xf32>
    %cst_66 = arith.constant 5.000000e-01 : f32
    %103 = vector.broadcast %cst_66 : f32 to vector<8x128xf32>
    %104 = arith.mulf %103, %102 : vector<8x128xf32>
    %105 = vector.extract_strided_slice %88 {offsets = [0, 256], sizes = [8, 128], strides = [1, 1]} : vector<8x512xf32> to vector<8x128xf32>
    %106 = math.tanh %105 : vector<8x128xf32>
    %107 = vector.extract_strided_slice %88 {offsets = [0, 384], sizes = [8, 128], strides = [1, 1]} : vector<8x512xf32> to vector<8x128xf32>
    %cst_67 = arith.constant 5.000000e-01 : f32
    %108 = vector.broadcast %cst_67 : f32 to vector<8x128xf32>
    %109 = arith.mulf %108, %107 : vector<8x128xf32>
    %110 = math.tanh %109 : vector<8x128xf32>
    %cst_68 = arith.constant 1.000000e+00 : f32
    %111 = vector.broadcast %cst_68 : f32 to vector<8x128xf32>
    %112 = arith.addf %110, %111 : vector<8x128xf32>
    %cst_69 = arith.constant 5.000000e-01 : f32
    %113 = vector.broadcast %cst_69 : f32 to vector<8x128xf32>
    %114 = arith.mulf %113, %112 : vector<8x128xf32>
    %115 = arith.mulf %104, %84 : vector<8x128xf32>
    %116 = arith.mulf %96, %106 : vector<8x128xf32>
    %117 = arith.addf %115, %116 : vector<8x128xf32>
    %118 = math.tanh %117 : vector<8x128xf32>
    %119 = arith.mulf %114, %118 : vector<8x128xf32>
    %c0_70 = arith.constant 0 : index
    %c0_71 = arith.constant 0 : index
    %120 = vector.load %arg8[%c0_70, %c0_71] : memref<64x128xf32, #tpu.memory_space<vmem>>, vector<8x128xf32>
    tpu.vector_store %arg8[%c0_70, %c0_71], %119 {strides = array<i32>} : memref<64x128xf32, #tpu.memory_space<vmem>>, vector<8x128xf32>,
    %c8_72 = arith.constant 8 : index
    %c0_73 = arith.constant 0 : index
    %121 = vector.load %arg7[%c8_72, %c0_73] : memref<64x512xf32, #tpu.memory_space<vmem>>, vector<8x512xf32>
    %122 = arith.truncf %119 : vector<8x128xf32> to vector<8x128xbf16>
    %cst_74 = arith.constant dense<0.000000e+00> : vector<8x512xf32>
    %123 = tpu.matmul %122, %82, %cst_74 {dimension_numbers = #tpu.dot_dimension_numbers<[1], [0], [0], [1], [0, 0, 1, 1], [], []>} : vector<8x128xbf16>, vector<128x512xbf16>, vector<8x512xf32> -> vector<8x512xf32>
    %124 = arith.addf %121, %123 : vector<8x512xf32>
    %125 = vector.extract_strided_slice %124 {offsets = [0, 0], sizes = [8, 128], strides = [1, 1]} : vector<8x512xf32> to vector<8x128xf32>
    %cst_75 = arith.constant 5.000000e-01 : f32
    %126 = vector.broadcast %cst_75 : f32 to vector<8x128xf32>
    %127 = arith.mulf %126, %125 : vector<8x128xf32>
    %128 = math.tanh %127 : vector<8x128xf32>
    %cst_76 = arith.constant 1.000000e+00 : f32
    %129 = vector.broadcast %cst_76 : f32 to vector<8x128xf32>
    %130 = arith.addf %128, %129 : vector<8x128xf32>
    %cst_77 = arith.constant 5.000000e-01 : f32
    %131 = vector.broadcast %cst_77 : f32 to vector<8x128xf32>
    %132 = arith.mulf %131, %130 : vector<8x128xf32>
    %133 = vector.extract_strided_slice %124 {offsets = [0, 128], sizes = [8, 128], strides = [1, 1]} : vector<8x512xf32> to vector<8x128xf32>
    %cst_78 = arith.constant 5.000000e-01 : f32
    %134 = vector.broadcast %cst_78 : f32 to vector<8x128xf32>
    %135 = arith.mulf %134, %133 : vector<8x128xf32>
    %136 = math.tanh %135 : vector<8x128xf32>
    %cst_79 = arith.constant 1.000000e+00 : f32
    %137 = vector.broadcast %cst_79 : f32 to vector<8x128xf32>
    %138 = arith.addf %136, %137 : vector<8x128xf32>
    %cst_80 = arith.constant 5.000000e-01 : f32
    %139 = vector.broadcast %cst_80 : f32 to vector<8x128xf32>
    %140 = arith.mulf %139, %138 : vector<8x128xf32>
    %141 = vector.extract_strided_slice %124 {offsets = [0, 256], sizes = [8, 128], strides = [1, 1]} : vector<8x512xf32> to vector<8x128xf32>
    %142 = math.tanh %141 : vector<8x128xf32>
    %143 = vector.extract_strided_slice %124 {offsets = [0, 384], sizes = [8, 128], strides = [1, 1]} : vector<8x512xf32> to vector<8x128xf32>
    %cst_81 = arith.constant 5.000000e-01 : f32
    %144 = vector.broadcast %cst_81 : f32 to vector<8x128xf32>
    %145 = arith.mulf %144, %143 : vector<8x128xf32>
    %146 = math.tanh %145 : vector<8x128xf32>
    %cst_82 = arith.constant 1.000000e+00 : f32
    %147 = vector.broadcast %cst_82 : f32 to vector<8x128xf32>
    %148 = arith.addf %146, %147 : vector<8x128xf32>
    %cst_83 = arith.constant 5.000000e-01 : f32
    %149 = vector.broadcast %cst_83 : f32 to vector<8x128xf32>
    %150 = arith.mulf %149, %148 : vector<8x128xf32>
    %151 = arith.mulf %140, %117 : vector<8x128xf32>
    %152 = arith.mulf %132, %142 : vector<8x128xf32>
    %153 = arith.addf %151, %152 : vector<8x128xf32>
    %154 = math.tanh %153 : vector<8x128xf32>
    %155 = arith.mulf %150, %154 : vector<8x128xf32>
    %c8_84 = arith.constant 8 : index
    %c0_85 = arith.constant 0 : index
    %156 = vector.load %arg8[%c8_84, %c0_85] : memref<64x128xf32, #tpu.memory_space<vmem>>, vector<8x128xf32>
    tpu.vector_store %arg8[%c8_84, %c0_85], %155 {strides = array<i32>} : memref<64x128xf32, #tpu.memory_space<vmem>>, vector<8x128xf32>,
    %c16_86 = arith.constant 16 : index
    %c0_87 = arith.constant 0 : index
    %157 = vector.load %arg7[%c16_86, %c0_87] : memref<64x512xf32, #tpu.memory_space<vmem>>, vector<8x512xf32>
    %158 = arith.truncf %155 : vector<8x128xf32> to vector<8x128xbf16>
    %cst_88 = arith.constant dense<0.000000e+00> : vector<8x512xf32>
    %159 = tpu.matmul %158, %82, %cst_88 {dimension_numbers = #tpu.dot_dimension_numbers<[1], [0], [0], [1], [0, 0, 1, 1], [], []>} : vector<8x128xbf16>, vector<128x512xbf16>, vector<8x512xf32> -> vector<8x512xf32>
    %160 = arith.addf %157, %159 : vector<8x512xf32>
    %161 = vector.extract_strided_slice %160 {offsets = [0, 0], sizes = [8, 128], strides = [1, 1]} : vector<8x512xf32> to vector<8x128xf32>
    %cst_89 = arith.constant 5.000000e-01 : f32
    %162 = vector.broadcast %cst_89 : f32 to vector<8x128xf32>
    %163 = arith.mulf %162, %161 : vector<8x128xf32>
    %164 = math.tanh %163 : vector<8x128xf32>
    %cst_90 = arith.constant 1.000000e+00 : f32
    %165 = vector.broadcast %cst_90 : f32 to vector<8x128xf32>
    %166 = arith.addf %164, %165 : vector<8x128xf32>
    %cst_91 = arith.constant 5.000000e-01 : f32
    %167 = vector.broadcast %cst_91 : f32 to vector<8x128xf32>
    %168 = arith.mulf %167, %166 : vector<8x128xf32>
    %169 = vector.extract_strided_slice %160 {offsets = [0, 128], sizes = [8, 128], strides = [1, 1]} : vector<8x512xf32> to vector<8x128xf32>
    %cst_92 = arith.constant 5.000000e-01 : f32
    %170 = vector.broadcast %cst_92 : f32 to vector<8x128xf32>
    %171 = arith.mulf %170, %169 : vector<8x128xf32>
    %172 = math.tanh %171 : vector<8x128xf32>
    %cst_93 = arith.constant 1.000000e+00 : f32
    %173 = vector.broadcast %cst_93 : f32 to vector<8x128xf32>
    %174 = arith.addf %172, %173 : vector<8x128xf32>
    %cst_94 = arith.constant 5.000000e-01 : f32
    %175 = vector.broadcast %cst_94 : f32 to vector<8x128xf32>
    %176 = arith.mulf %175, %174 : vector<8x128xf32>
    %177 = vector.extract_strided_slice %160 {offsets = [0, 256], sizes = [8, 128], strides = [1, 1]} : vector<8x512xf32> to vector<8x128xf32>
    %178 = math.tanh %177 : vector<8x128xf32>
    %179 = vector.extract_strided_slice %160 {offsets = [0, 384], sizes = [8, 128], strides = [1, 1]} : vector<8x512xf32> to vector<8x128xf32>
    %cst_95 = arith.constant 5.000000e-01 : f32
    %180 = vector.broadcast %cst_95 : f32 to vector<8x128xf32>
    %181 = arith.mulf %180, %179 : vector<8x128xf32>
    %182 = math.tanh %181 : vector<8x128xf32>
    %cst_96 = arith.constant 1.000000e+00 : f32
    %183 = vector.broadcast %cst_96 : f32 to vector<8x128xf32>
    %184 = arith.addf %182, %183 : vector<8x128xf32>
    %cst_97 = arith.constant 5.000000e-01 : f32
    %185 = vector.broadcast %cst_97 : f32 to vector<8x128xf32>
    %186 = arith.mulf %185, %184 : vector<8x128xf32>
    %187 = arith.mulf %176, %153 : vector<8x128xf32>
    %188 = arith.mulf %168, %178 : vector<8x128xf32>
    %189 = arith.addf %187, %188 : vector<8x128xf32>
    %190 = math.tanh %189 : vector<8x128xf32>
    %191 = arith.mulf %186, %190 : vector<8x128xf32>
    %c16_98 = arith.constant 16 : index
    %c0_99 = arith.constant 0 : index
    %192 = vector.load %arg8[%c16_98, %c0_99] : memref<64x128xf32, #tpu.memory_space<vmem>>, vector<8x128xf32>
    tpu.vector_store %arg8[%c16_98, %c0_99], %191 {strides = array<i32>} : memref<64x128xf32, #tpu.memory_space<vmem>>, vector<8x128xf32>,
    %c24_100 = arith.constant 24 : index
    %c0_101 = arith.constant 0 : index
    %193 = vector.load %arg7[%c24_100, %c0_101] : memref<64x512xf32, #tpu.memory_space<vmem>>, vector<8x512xf32>
    %194 = arith.truncf %191 : vector<8x128xf32> to vector<8x128xbf16>
    %cst_102 = arith.constant dense<0.000000e+00> : vector<8x512xf32>
    %195 = tpu.matmul %194, %82, %cst_102 {dimension_numbers = #tpu.dot_dimension_numbers<[1], [0], [0], [1], [0, 0, 1, 1], [], []>} : vector<8x128xbf16>, vector<128x512xbf16>, vector<8x512xf32> -> vector<8x512xf32>
    %196 = arith.addf %193, %195 : vector<8x512xf32>
    %197 = vector.extract_strided_slice %196 {offsets = [0, 0], sizes = [8, 128], strides = [1, 1]} : vector<8x512xf32> to vector<8x128xf32>
    %cst_103 = arith.constant 5.000000e-01 : f32
    %198 = vector.broadcast %cst_103 : f32 to vector<8x128xf32>
    %199 = arith.mulf %198, %197 : vector<8x128xf32>
    %200 = math.tanh %199 : vector<8x128xf32>
    %cst_104 = arith.constant 1.000000e+00 : f32
    %201 = vector.broadcast %cst_104 : f32 to vector<8x128xf32>
    %202 = arith.addf %200, %201 : vector<8x128xf32>
    %cst_105 = arith.constant 5.000000e-01 : f32
    %203 = vector.broadcast %cst_105 : f32 to vector<8x128xf32>
    %204 = arith.mulf %203, %202 : vector<8x128xf32>
    %205 = vector.extract_strided_slice %196 {offsets = [0, 128], sizes = [8, 128], strides = [1, 1]} : vector<8x512xf32> to vector<8x128xf32>
    %cst_106 = arith.constant 5.000000e-01 : f32
    %206 = vector.broadcast %cst_106 : f32 to vector<8x128xf32>
    %207 = arith.mulf %206, %205 : vector<8x128xf32>
    %208 = math.tanh %207 : vector<8x128xf32>
    %cst_107 = arith.constant 1.000000e+00 : f32
    %209 = vector.broadcast %cst_107 : f32 to vector<8x128xf32>
    %210 = arith.addf %208, %209 : vector<8x128xf32>
    %cst_108 = arith.constant 5.000000e-01 : f32
    %211 = vector.broadcast %cst_108 : f32 to vector<8x128xf32>
    %212 = arith.mulf %211, %210 : vector<8x128xf32>
    %213 = vector.extract_strided_slice %196 {offsets = [0, 256], sizes = [8, 128], strides = [1, 1]} : vector<8x512xf32> to vector<8x128xf32>
    %214 = math.tanh %213 : vector<8x128xf32>
    %215 = vector.extract_strided_slice %196 {offsets = [0, 384], sizes = [8, 128], strides = [1, 1]} : vector<8x512xf32> to vector<8x128xf32>
    %cst_109 = arith.constant 5.000000e-01 : f32
    %216 = vector.broadcast %cst_109 : f32 to vector<8x128xf32>
    %217 = arith.mulf %216, %215 : vector<8x128xf32>
    %218 = math.tanh %217 : vector<8x128xf32>
    %cst_110 = arith.constant 1.000000e+00 : f32
    %219 = vector.broadcast %cst_110 : f32 to vector<8x128xf32>
    %220 = arith.addf %218, %219 : vector<8x128xf32>
    %cst_111 = arith.constant 5.000000e-01 : f32
    %221 = vector.broadcast %cst_111 : f32 to vector<8x128xf32>
    %222 = arith.mulf %221, %220 : vector<8x128xf32>
    %223 = arith.mulf %212, %189 : vector<8x128xf32>
    %224 = arith.mulf %204, %214 : vector<8x128xf32>
    %225 = arith.addf %223, %224 : vector<8x128xf32>
    %226 = math.tanh %225 : vector<8x128xf32>
    %227 = arith.mulf %222, %226 : vector<8x128xf32>
    %c24_112 = arith.constant 24 : index
    %c0_113 = arith.constant 0 : index
    %228 = vector.load %arg8[%c24_112, %c0_113] : memref<64x128xf32, #tpu.memory_space<vmem>>, vector<8x128xf32>
    tpu.vector_store %arg8[%c24_112, %c0_113], %227 {strides = array<i32>} : memref<64x128xf32, #tpu.memory_space<vmem>>, vector<8x128xf32>,
    %c32_114 = arith.constant 32 : index
    %c0_115 = arith.constant 0 : index
    %229 = vector.load %arg7[%c32_114, %c0_115] : memref<64x512xf32, #tpu.memory_space<vmem>>, vector<8x512xf32>
    %230 = arith.truncf %227 : vector<8x128xf32> to vector<8x128xbf16>
    %cst_116 = arith.constant dense<0.000000e+00> : vector<8x512xf32>
    %231 = tpu.matmul %230, %82, %cst_116 {dimension_numbers = #tpu.dot_dimension_numbers<[1], [0], [0], [1], [0, 0, 1, 1], [], []>} : vector<8x128xbf16>, vector<128x512xbf16>, vector<8x512xf32> -> vector<8x512xf32>
    %232 = arith.addf %229, %231 : vector<8x512xf32>
    %233 = vector.extract_strided_slice %232 {offsets = [0, 0], sizes = [8, 128], strides = [1, 1]} : vector<8x512xf32> to vector<8x128xf32>
    %cst_117 = arith.constant 5.000000e-01 : f32
    %234 = vector.broadcast %cst_117 : f32 to vector<8x128xf32>
    %235 = arith.mulf %234, %233 : vector<8x128xf32>
    %236 = math.tanh %235 : vector<8x128xf32>
    %cst_118 = arith.constant 1.000000e+00 : f32
    %237 = vector.broadcast %cst_118 : f32 to vector<8x128xf32>
    %238 = arith.addf %236, %237 : vector<8x128xf32>
    %cst_119 = arith.constant 5.000000e-01 : f32
    %239 = vector.broadcast %cst_119 : f32 to vector<8x128xf32>
    %240 = arith.mulf %239, %238 : vector<8x128xf32>
    %241 = vector.extract_strided_slice %232 {offsets = [0, 128], sizes = [8, 128], strides = [1, 1]} : vector<8x512xf32> to vector<8x128xf32>
    %cst_120 = arith.constant 5.000000e-01 : f32
    %242 = vector.broadcast %cst_120 : f32 to vector<8x128xf32>
    %243 = arith.mulf %242, %241 : vector<8x128xf32>
    %244 = math.tanh %243 : vector<8x128xf32>
    %cst_121 = arith.constant 1.000000e+00 : f32
    %245 = vector.broadcast %cst_121 : f32 to vector<8x128xf32>
    %246 = arith.addf %244, %245 : vector<8x128xf32>
    %cst_122 = arith.constant 5.000000e-01 : f32
    %247 = vector.broadcast %cst_122 : f32 to vector<8x128xf32>
    %248 = arith.mulf %247, %246 : vector<8x128xf32>
    %249 = vector.extract_strided_slice %232 {offsets = [0, 256], sizes = [8, 128], strides = [1, 1]} : vector<8x512xf32> to vector<8x128xf32>
    %250 = math.tanh %249 : vector<8x128xf32>
    %251 = vector.extract_strided_slice %232 {offsets = [0, 384], sizes = [8, 128], strides = [1, 1]} : vector<8x512xf32> to vector<8x128xf32>
    %cst_123 = arith.constant 5.000000e-01 : f32
    %252 = vector.broadcast %cst_123 : f32 to vector<8x128xf32>
    %253 = arith.mulf %252, %251 : vector<8x128xf32>
    %254 = math.tanh %253 : vector<8x128xf32>
    %cst_124 = arith.constant 1.000000e+00 : f32
    %255 = vector.broadcast %cst_124 : f32 to vector<8x128xf32>
    %256 = arith.addf %254, %255 : vector<8x128xf32>
    %cst_125 = arith.constant 5.000000e-01 : f32
    %257 = vector.broadcast %cst_125 : f32 to vector<8x128xf32>
    %258 = arith.mulf %257, %256 : vector<8x128xf32>
    %259 = arith.mulf %248, %225 : vector<8x128xf32>
    %260 = arith.mulf %240, %250 : vector<8x128xf32>
    %261 = arith.addf %259, %260 : vector<8x128xf32>
    %262 = math.tanh %261 : vector<8x128xf32>
    %263 = arith.mulf %258, %262 : vector<8x128xf32>
    %c32_126 = arith.constant 32 : index
    %c0_127 = arith.constant 0 : index
    %264 = vector.load %arg8[%c32_126, %c0_127] : memref<64x128xf32, #tpu.memory_space<vmem>>, vector<8x128xf32>
    tpu.vector_store %arg8[%c32_126, %c0_127], %263 {strides = array<i32>} : memref<64x128xf32, #tpu.memory_space<vmem>>, vector<8x128xf32>,
    %c40_128 = arith.constant 40 : index
    %c0_129 = arith.constant 0 : index
    %265 = vector.load %arg7[%c40_128, %c0_129] : memref<64x512xf32, #tpu.memory_space<vmem>>, vector<8x512xf32>
    %266 = arith.truncf %263 : vector<8x128xf32> to vector<8x128xbf16>
    %cst_130 = arith.constant dense<0.000000e+00> : vector<8x512xf32>
    %267 = tpu.matmul %266, %82, %cst_130 {dimension_numbers = #tpu.dot_dimension_numbers<[1], [0], [0], [1], [0, 0, 1, 1], [], []>} : vector<8x128xbf16>, vector<128x512xbf16>, vector<8x512xf32> -> vector<8x512xf32>
    %268 = arith.addf %265, %267 : vector<8x512xf32>
    %269 = vector.extract_strided_slice %268 {offsets = [0, 0], sizes = [8, 128], strides = [1, 1]} : vector<8x512xf32> to vector<8x128xf32>
    %cst_131 = arith.constant 5.000000e-01 : f32
    %270 = vector.broadcast %cst_131 : f32 to vector<8x128xf32>
    %271 = arith.mulf %270, %269 : vector<8x128xf32>
    %272 = math.tanh %271 : vector<8x128xf32>
    %cst_132 = arith.constant 1.000000e+00 : f32
    %273 = vector.broadcast %cst_132 : f32 to vector<8x128xf32>
    %274 = arith.addf %272, %273 : vector<8x128xf32>
    %cst_133 = arith.constant 5.000000e-01 : f32
    %275 = vector.broadcast %cst_133 : f32 to vector<8x128xf32>
    %276 = arith.mulf %275, %274 : vector<8x128xf32>
    %277 = vector.extract_strided_slice %268 {offsets = [0, 128], sizes = [8, 128], strides = [1, 1]} : vector<8x512xf32> to vector<8x128xf32>
    %cst_134 = arith.constant 5.000000e-01 : f32
    %278 = vector.broadcast %cst_134 : f32 to vector<8x128xf32>
    %279 = arith.mulf %278, %277 : vector<8x128xf32>
    %280 = math.tanh %279 : vector<8x128xf32>
    %cst_135 = arith.constant 1.000000e+00 : f32
    %281 = vector.broadcast %cst_135 : f32 to vector<8x128xf32>
    %282 = arith.addf %280, %281 : vector<8x128xf32>
    %cst_136 = arith.constant 5.000000e-01 : f32
    %283 = vector.broadcast %cst_136 : f32 to vector<8x128xf32>
    %284 = arith.mulf %283, %282 : vector<8x128xf32>
    %285 = vector.extract_strided_slice %268 {offsets = [0, 256], sizes = [8, 128], strides = [1, 1]} : vector<8x512xf32> to vector<8x128xf32>
    %286 = math.tanh %285 : vector<8x128xf32>
    %287 = vector.extract_strided_slice %268 {offsets = [0, 384], sizes = [8, 128], strides = [1, 1]} : vector<8x512xf32> to vector<8x128xf32>
    %cst_137 = arith.constant 5.000000e-01 : f32
    %288 = vector.broadcast %cst_137 : f32 to vector<8x128xf32>
    %289 = arith.mulf %288, %287 : vector<8x128xf32>
    %290 = math.tanh %289 : vector<8x128xf32>
    %cst_138 = arith.constant 1.000000e+00 : f32
    %291 = vector.broadcast %cst_138 : f32 to vector<8x128xf32>
    %292 = arith.addf %290, %291 : vector<8x128xf32>
    %cst_139 = arith.constant 5.000000e-01 : f32
    %293 = vector.broadcast %cst_139 : f32 to vector<8x128xf32>
    %294 = arith.mulf %293, %292 : vector<8x128xf32>
    %295 = arith.mulf %284, %261 : vector<8x128xf32>
    %296 = arith.mulf %276, %286 : vector<8x128xf32>
    %297 = arith.addf %295, %296 : vector<8x128xf32>
    %298 = math.tanh %297 : vector<8x128xf32>
    %299 = arith.mulf %294, %298 : vector<8x128xf32>
    %c40_140 = arith.constant 40 : index
    %c0_141 = arith.constant 0 : index
    %300 = vector.load %arg8[%c40_140, %c0_141] : memref<64x128xf32, #tpu.memory_space<vmem>>, vector<8x128xf32>
    tpu.vector_store %arg8[%c40_140, %c0_141], %299 {strides = array<i32>} : memref<64x128xf32, #tpu.memory_space<vmem>>, vector<8x128xf32>,
    %c48_142 = arith.constant 48 : index
    %c0_143 = arith.constant 0 : index
    %301 = vector.load %arg7[%c48_142, %c0_143] : memref<64x512xf32, #tpu.memory_space<vmem>>, vector<8x512xf32>
    %302 = arith.truncf %299 : vector<8x128xf32> to vector<8x128xbf16>
    %cst_144 = arith.constant dense<0.000000e+00> : vector<8x512xf32>
    %303 = tpu.matmul %302, %82, %cst_144 {dimension_numbers = #tpu.dot_dimension_numbers<[1], [0], [0], [1], [0, 0, 1, 1], [], []>} : vector<8x128xbf16>, vector<128x512xbf16>, vector<8x512xf32> -> vector<8x512xf32>
    %304 = arith.addf %301, %303 : vector<8x512xf32>
    %305 = vector.extract_strided_slice %304 {offsets = [0, 0], sizes = [8, 128], strides = [1, 1]} : vector<8x512xf32> to vector<8x128xf32>
    %cst_145 = arith.constant 5.000000e-01 : f32
    %306 = vector.broadcast %cst_145 : f32 to vector<8x128xf32>
    %307 = arith.mulf %306, %305 : vector<8x128xf32>
    %308 = math.tanh %307 : vector<8x128xf32>
    %cst_146 = arith.constant 1.000000e+00 : f32
    %309 = vector.broadcast %cst_146 : f32 to vector<8x128xf32>
    %310 = arith.addf %308, %309 : vector<8x128xf32>
    %cst_147 = arith.constant 5.000000e-01 : f32
    %311 = vector.broadcast %cst_147 : f32 to vector<8x128xf32>
    %312 = arith.mulf %311, %310 : vector<8x128xf32>
    %313 = vector.extract_strided_slice %304 {offsets = [0, 128], sizes = [8, 128], strides = [1, 1]} : vector<8x512xf32> to vector<8x128xf32>
    %cst_148 = arith.constant 5.000000e-01 : f32
    %314 = vector.broadcast %cst_148 : f32 to vector<8x128xf32>
    %315 = arith.mulf %314, %313 : vector<8x128xf32>
    %316 = math.tanh %315 : vector<8x128xf32>
    %cst_149 = arith.constant 1.000000e+00 : f32
    %317 = vector.broadcast %cst_149 : f32 to vector<8x128xf32>
    %318 = arith.addf %316, %317 : vector<8x128xf32>
    %cst_150 = arith.constant 5.000000e-01 : f32
    %319 = vector.broadcast %cst_150 : f32 to vector<8x128xf32>
    %320 = arith.mulf %319, %318 : vector<8x128xf32>
    %321 = vector.extract_strided_slice %304 {offsets = [0, 256], sizes = [8, 128], strides = [1, 1]} : vector<8x512xf32> to vector<8x128xf32>
    %322 = math.tanh %321 : vector<8x128xf32>
    %323 = vector.extract_strided_slice %304 {offsets = [0, 384], sizes = [8, 128], strides = [1, 1]} : vector<8x512xf32> to vector<8x128xf32>
    %cst_151 = arith.constant 5.000000e-01 : f32
    %324 = vector.broadcast %cst_151 : f32 to vector<8x128xf32>
    %325 = arith.mulf %324, %323 : vector<8x128xf32>
    %326 = math.tanh %325 : vector<8x128xf32>
    %cst_152 = arith.constant 1.000000e+00 : f32
    %327 = vector.broadcast %cst_152 : f32 to vector<8x128xf32>
    %328 = arith.addf %326, %327 : vector<8x128xf32>
    %cst_153 = arith.constant 5.000000e-01 : f32
    %329 = vector.broadcast %cst_153 : f32 to vector<8x128xf32>
    %330 = arith.mulf %329, %328 : vector<8x128xf32>
    %331 = arith.mulf %320, %297 : vector<8x128xf32>
    %332 = arith.mulf %312, %322 : vector<8x128xf32>
    %333 = arith.addf %331, %332 : vector<8x128xf32>
    %334 = math.tanh %333 : vector<8x128xf32>
    %335 = arith.mulf %330, %334 : vector<8x128xf32>
    %c48_154 = arith.constant 48 : index
    %c0_155 = arith.constant 0 : index
    %336 = vector.load %arg8[%c48_154, %c0_155] : memref<64x128xf32, #tpu.memory_space<vmem>>, vector<8x128xf32>
    tpu.vector_store %arg8[%c48_154, %c0_155], %335 {strides = array<i32>} : memref<64x128xf32, #tpu.memory_space<vmem>>, vector<8x128xf32>,
    %c56_156 = arith.constant 56 : index
    %c0_157 = arith.constant 0 : index
    %337 = vector.load %arg7[%c56_156, %c0_157] : memref<64x512xf32, #tpu.memory_space<vmem>>, vector<8x512xf32>
    %338 = arith.truncf %335 : vector<8x128xf32> to vector<8x128xbf16>
    %cst_158 = arith.constant dense<0.000000e+00> : vector<8x512xf32>
    %339 = tpu.matmul %338, %82, %cst_158 {dimension_numbers = #tpu.dot_dimension_numbers<[1], [0], [0], [1], [0, 0, 1, 1], [], []>} : vector<8x128xbf16>, vector<128x512xbf16>, vector<8x512xf32> -> vector<8x512xf32>
    %340 = arith.addf %337, %339 : vector<8x512xf32>
    %341 = vector.extract_strided_slice %340 {offsets = [0, 0], sizes = [8, 128], strides = [1, 1]} : vector<8x512xf32> to vector<8x128xf32>
    %cst_159 = arith.constant 5.000000e-01 : f32
    %342 = vector.broadcast %cst_159 : f32 to vector<8x128xf32>
    %343 = arith.mulf %342, %341 : vector<8x128xf32>
    %344 = math.tanh %343 : vector<8x128xf32>
    %cst_160 = arith.constant 1.000000e+00 : f32
    %345 = vector.broadcast %cst_160 : f32 to vector<8x128xf32>
    %346 = arith.addf %344, %345 : vector<8x128xf32>
    %cst_161 = arith.constant 5.000000e-01 : f32
    %347 = vector.broadcast %cst_161 : f32 to vector<8x128xf32>
    %348 = arith.mulf %347, %346 : vector<8x128xf32>
    %349 = vector.extract_strided_slice %340 {offsets = [0, 128], sizes = [8, 128], strides = [1, 1]} : vector<8x512xf32> to vector<8x128xf32>
    %cst_162 = arith.constant 5.000000e-01 : f32
    %350 = vector.broadcast %cst_162 : f32 to vector<8x128xf32>
    %351 = arith.mulf %350, %349 : vector<8x128xf32>
    %352 = math.tanh %351 : vector<8x128xf32>
    %cst_163 = arith.constant 1.000000e+00 : f32
    %353 = vector.broadcast %cst_163 : f32 to vector<8x128xf32>
    %354 = arith.addf %352, %353 : vector<8x128xf32>
    %cst_164 = arith.constant 5.000000e-01 : f32
    %355 = vector.broadcast %cst_164 : f32 to vector<8x128xf32>
    %356 = arith.mulf %355, %354 : vector<8x128xf32>
    %357 = vector.extract_strided_slice %340 {offsets = [0, 256], sizes = [8, 128], strides = [1, 1]} : vector<8x512xf32> to vector<8x128xf32>
    %358 = math.tanh %357 : vector<8x128xf32>
    %359 = vector.extract_strided_slice %340 {offsets = [0, 384], sizes = [8, 128], strides = [1, 1]} : vector<8x512xf32> to vector<8x128xf32>
    %cst_165 = arith.constant 5.000000e-01 : f32
    %360 = vector.broadcast %cst_165 : f32 to vector<8x128xf32>
    %361 = arith.mulf %360, %359 : vector<8x128xf32>
    %362 = math.tanh %361 : vector<8x128xf32>
    %cst_166 = arith.constant 1.000000e+00 : f32
    %363 = vector.broadcast %cst_166 : f32 to vector<8x128xf32>
    %364 = arith.addf %362, %363 : vector<8x128xf32>
    %cst_167 = arith.constant 5.000000e-01 : f32
    %365 = vector.broadcast %cst_167 : f32 to vector<8x128xf32>
    %366 = arith.mulf %365, %364 : vector<8x128xf32>
    %367 = arith.mulf %356, %333 : vector<8x128xf32>
    %368 = arith.mulf %348, %358 : vector<8x128xf32>
    %369 = arith.addf %367, %368 : vector<8x128xf32>
    %370 = math.tanh %369 : vector<8x128xf32>
    %371 = arith.mulf %366, %370 : vector<8x128xf32>
    %c56_168 = arith.constant 56 : index
    %c0_169 = arith.constant 0 : index
    %372 = vector.load %arg8[%c56_168, %c0_169] : memref<64x128xf32, #tpu.memory_space<vmem>>, vector<8x128xf32>
    tpu.vector_store %arg8[%c56_168, %c0_169], %371 {strides = array<i32>} : memref<64x128xf32, #tpu.memory_space<vmem>>, vector<8x128xf32>,
    %c0_170 = arith.constant 0 : index
    %c0_171 = arith.constant 0 : index
    %373 = vector.load %arg8[%c0_170, %c0_171] : memref<64x128xf32, #tpu.memory_space<vmem>>, vector<64x128xf32>
    %374 = arith.truncf %373 : vector<64x128xf32> to vector<64x128xbf16>
    %c0_172 = arith.constant 0 : index
    %c0_173 = arith.constant 0 : index
    %375 = vector.load %arg4[%c0_172, %c0_173] : memref<128x128xbf16, #tpu.memory_space<vmem>>, vector<128x128xbf16>
    %cst_174 = arith.constant dense<0.000000e+00> : vector<64x128xf32>
    %376 = tpu.matmul %374, %375, %cst_174 {dimension_numbers = #tpu.dot_dimension_numbers<[1], [0], [0], [1], [0, 0, 1, 1], [], []>} : vector<64x128xbf16>, vector<128x128xbf16>, vector<64x128xf32> -> vector<64x128xf32>
    %c0_175 = arith.constant 0 : index
    %c0_176 = arith.constant 0 : index
    %377 = vector.load %arg5[%c0_175, %c0_176] : memref<1x128xf32, #tpu.memory_space<vmem>>, vector<1x128xf32>
    %378 = vector.broadcast %377 : vector<1x128xf32> to vector<64x128xf32>
    %379 = arith.addf %376, %378 : vector<64x128xf32>
    %cst_177 = arith.constant dense<0xFF800000> : vector<64xf32>
    %380 = vector.multi_reduction <maximumf>, %379, %cst_177 [1] : vector<64x128xf32> to vector<64xf32>
    %381 = vector.shape_cast %380 : vector<64xf32> to vector<64x1xf32>
    %382 = vector.broadcast %381 : vector<64x1xf32> to vector<64x128xf32>
    %383 = arith.subf %379, %382 : vector<64x128xf32>
    %384 = math.exp %383 : vector<64x128xf32>
    %cst_178 = arith.constant dense<0.000000e+00> : vector<64xf32>
    %385 = vector.multi_reduction <add>, %384, %cst_178 [1] : vector<64x128xf32> to vector<64xf32>
    %386 = vector.shape_cast %385 : vector<64xf32> to vector<64x1xf32>
    %387 = math.log %386 : vector<64x1xf32>
    %388 = arith.addf %381, %387 : vector<64x1xf32>
    %389 = vector.broadcast %388 : vector<64x1xf32> to vector<64x128xf32>
    %390 = arith.subf %379, %389 : vector<64x128xf32>
    %c0_179 = arith.constant 0 : index
    %c0_180 = arith.constant 0 : index
    %391 = vector.load %arg6[%c0_179, %c0_180] : memref<64x128xf32, #tpu.memory_space<vmem>>, vector<64x128xf32>
    tpu.vector_store %arg6[%c0_179, %c0_180], %390 {strides = array<i32>} : memref<64x128xf32, #tpu.memory_space<vmem>>, vector<64x128xf32>,
    return
  }
  func.func @transform_0(%arg0: i32, %arg1: memref<16xi32, #tpu.memory_space<smem>>) -> (i32, i32, i32) {
    %c0_i32 = arith.constant 0 : i32
    %c0_i32_0 = arith.constant 0 : i32
    %c0_i32_1 = arith.constant 0 : i32
    %c0_i32_2 = arith.constant 0 : i32
    return %c0_i32, %c0_i32_0, %c0_i32_1 : i32, i32, i32
  }
  func.func @transform_1(%arg0: i32, %arg1: memref<16xi32, #tpu.memory_space<smem>>) -> (i32, i32) {
    %c0_i32 = arith.constant 0 : i32
    %c0_i32_0 = arith.constant 0 : i32
    %c0_i32_1 = arith.constant 0 : i32
    return %c0_i32, %c0_i32_0 : i32, i32
  }
  func.func @transform_2(%arg0: i32, %arg1: memref<16xi32, #tpu.memory_space<smem>>) -> (i32, i32) {
    %c0_i32 = arith.constant 0 : i32
    %c0_i32_0 = arith.constant 0 : i32
    %c0_i32_1 = arith.constant 0 : i32
    return %c0_i32, %c0_i32_0 : i32, i32
  }
  func.func @transform_3(%arg0: i32, %arg1: memref<16xi32, #tpu.memory_space<smem>>) -> (i32, i32) {
    %c0_i32 = arith.constant 0 : i32
    %c0_i32_0 = arith.constant 0 : i32
    %c0_i32_1 = arith.constant 0 : i32
    return %c0_i32, %c0_i32_0 : i32, i32
  }
  func.func @transform_4(%arg0: i32, %arg1: memref<16xi32, #tpu.memory_space<smem>>) -> (i32, i32) {
    %c0_i32 = arith.constant 0 : i32
    %c0_i32_0 = arith.constant 0 : i32
    %c0_i32_1 = arith.constant 0 : i32
    return %c0_i32, %c0_i32_0 : i32, i32
  }
}

</mosaic_0001>

<bundles_post_ra>
// kernel: jazz_melody_lstm_forward.1
= control target key start
LH: loop header
LB: loop body
LE: loop exit
PB: predicated region body
PF: predicated region fallthrough
CT: control target
= control target key end

     0   :  { %s2593_s0 = inlined_call_operand.vmem [shape: s32[16], index: 0, kind: input, shape index: {}]   ;;  %s2594_s1 = inlined_call_operand.hbm [shape: f32[10,1,512], index: 1, kind: input, shape index: {}]   ;;  %s2595_s2 = inlined_call_operand.hbm [shape: bf16[128,512], index: 2, kind: input, shape index: {}]   ;;  %s2596_s3 = inlined_call_operand.hbm [shape: bf16[128,128], index: 3, kind: input, shape index: {}]   ;;  %s2597_s4 = inlined_call_operand.vmem [shape: f32[1,128], index: 4, kind: input, shape index: {}]   ;;  %s2598_s5 = inlined_call_operand.vmem [shape: f32[64,128], index: 5, kind: output, shape index: {}]  }
   0x1   :  { %s10_s20 = sshll.u32 %s2593_s0, 4  ;;  %s11_s20 = int_to_ptr.vmem [resolvable:$true] %s10_s20 }
   0x2   :  { %s1883_s21 = scalar_lea.vmem %s11_s20, 16  ;;  %p1888_p1 = scmp.lt.s32.totalorder %s11_s20, %s11_s20 }
   0x3   :  { %p1884_p0 = scmp.ne.s32.totalorder %s11_s20, %s1883_s21  ;;  %p1889_p2 = scmp.lt.s32.totalorder %s1883_s21, %s1883_s21 }
   0x5   :  { %p1890_p3 = por %p1889_p2, %p1888_p1 }
   0x7   :  { %p1891_p4 = pnand %p1890_p3, %p1884_p0 }
   0x9   :  { %1894 = shalt.err (!%p1891_p4)  }
   0xa   :  { %s1967_s22 = smov [#allocation5]  }
   0xb   :  { %13 = dma.vmem_to_smem %s11_s20, 16, %s1967_s22, [#allocation4] }
   0xc   :  { %1961 = dma.done.wait [#allocation4], 16 }
   0xd   :  { %1962 = vsyncadd [#allocation4], 4294967280 }
   0xe   :  { %15 = sfence }
   0xf   :  { %16 = vsyncpa [#allocation7], 0 }
  0x10   :  { %17 = vsyncpa [#allocation9], 0  ;;  %s1968_s23 = smov [#allocation8]   ;;  %s1895_s26 = scalar_lea.hbm %s2595_s2, 4096 }
  0x11   :  { %s35_s24 = sshll.u32 %s1968_s23, 4  ;;  %p1896_p5 = scmp.ne.s32.totalorder %s2595_s2, %s1895_s26  ;;  %s36_s24 = int_to_ptr.vmem [resolvable:$true] %s35_s24 }
  0x12   :  { %p1899_p6 = scmp.lt.u32.totalorder %s1895_s26, %s2595_s2 }
  0x14   :  { %p1901_p7 = pnand %p1899_p6, %p1896_p5 }
  0x16   :  { %1904 = shalt.err (!%p1901_p7)
}
  0x17   :  { %s1905_s6 = scalar_lea.vmem %s36_s24, 4096  ;;  %p1910_p9 = scmp.lt.s32.totalorder %s36_s24, %s36_s24 }
  0x18   :  { %p1906_p8 = scmp.ne.s32.totalorder %s36_s24, %s1905_s6  ;;  %p1911_p10 = scmp.lt.s32.totalorder %s1905_s6, %s1905_s6 }
  0x1a   :  { %p1912_p11 = por %p1911_p10, %p1910_p9 }
  0x1c   :  { %p1913_p12 = pnand %p1912_p11, %p1906_p8 }
  0x1e   :  { %1916 = shalt.err (!%p1913_p12)
}
  0x1f   :  { %s1969_s7 = smov 256   ;;  %s1970_s8 = smov 16  }
  0x20   :  { %41 = dma.hbm_to_vmem [thread:$0]  %s2595_s2, 4096, %s36_s24, [#allocation9], %s1969_s7, %s1969_s7, %s1970_s8  }
  0x21   :  { %s1971_s11 = smov [#allocation6]   ;;  %s1917_s15 = scalar_lea.hbm %s2594_s1, 640 }
  0x22   :  { %s23_s12 = sshll.u32 %s1971_s11, 4  ;;  %p1918_p13 = scmp.ne.s32.totalorder %s2594_s1, %s1917_s15  ;;  %s24_s12 = int_to_ptr.vmem [resolvable:$true] %s23_s12 }
  0x23   :  { %p1921_p0 = scmp.lt.u32.totalorder %s1917_s15, %s2594_s1 }
  0x25   :  { %p1923_p1 = pnand %p1921_p0, %p1918_p13 }
  0x27   :  { %1926 = shalt.err (!%p1923_p1)
}
  0x28   :  { %s1927_s20 = scalar_lea.vmem %s24_s12, 640  ;;  %p1932_p3 = scmp.lt.s32.totalorder %s24_s12, %s24_s12 }
  0x29   :  { %p1928_p2 = scmp.ne.s32.totalorder %s24_s12, %s1927_s20  ;;  %p1933_p4 = scmp.lt.s32.totalorder %s1927_s20, %s1927_s20 }
  0x2b   :  { %p1934_p5 = por %p1933_p4, %p1932_p3 }
  0x2d   :  { %p1935_p6 = pnand %p1934_p5, %p1928_p2 }
  0x2f   :  { %1938 = shalt.err (!%p1935_p6)
}
  0x30   :  { %s1972_s2 = smov 64   ;;  %s1973_s21 = smov 4  }
  0x31   :  { %29 = dma.hbm_to_vmem [thread:$0]  %s2594_s1, 640, %s24_s12, [#allocation7], %s1972_s2, %s1972_s2, %s1973_s21  }
  0x32   :  { %s1974_s24 = smov [#allocation10]   ;;  %s1939_s27 = scalar_lea.hbm %s2596_s3, 1024 }
  0x33   :  { %s47_s25 = sshll.u32 %s1974_s24, 4  ;;  %p1940_p7 = scmp.ne.s32.totalorder %s2596_s3, %s1939_s27  ;;  %s48_s25 = int_to_ptr.vmem [resolvable:$true] %s47_s25 }
  0x34   :  { %p1943_p8 = scmp.lt.u32.totalorder %s1939_s27, %s2596_s3 }
  0x36   :  { %p1945_p9 = pnand %p1943_p8, %p1940_p7 }
  0x38   :  { %1948 = shalt.err (!%p1945_p9)
}
  0x39   :  { %s1949_s7 = scalar_lea.vmem %s48_s25, 1024  ;;  %p1954_p11 = scmp.lt.s32.totalorder %s48_s25, %s48_s25 }
  0x3a   :  { %p1950_p10 = scmp.ne.s32.totalorder %s48_s25, %s1949_s7  ;;  %p1955_p12 = scmp.lt.s32.totalorder %s1949_s7, %s1949_s7 }
  0x3c   :  { %p1956_p13 = por %p1955_p12, %p1954_p11 }
  0x3e   :  { %p1957_p0 = pnand %p1956_p13, %p1950_p10 }
  0x40   :  { %1960 = shalt.err (!%p1957_p0)
}
  0x41   :  { %53 = dma.hbm_to_vmem [thread:$0]  %s2596_s3, 1024, %s48_s25, [#allocation9], %s1972_s2, %s1972_s2, %s1973_s21  }
  0x42   :  { %1963 = dma.done.wait [#allocation7], 640  }
  0x43   :  { %1964 = vsyncadd [#allocation7], 4294966656 }
  0x44   :  { %1965 = dma.done.wait [#allocation9], 5120  }
  0x45   :  { %1966 = vsyncadd [#allocation9], 4294962176  ;;  %v1975_v0 = vmov 0   ;;  %v1976_v1 = vmov 0.0   ;;  %v2048_v2 = vld [vmem:[#allocation8 + $0x4] ss:$16 sps:$4 sm:$0xff]   ;;  %v102_v12 = vlaneseq }
  0x46   :  { %441 = vmatprep.mubr.bf16.mxu1 %v1975_v0  ;;  %66 = vst [vmem:[#allocation2] sm:$0xff] %v1976_v1  ;;  %67 = vst [vmem:[#allocation2 + $0x8] sm:$0xff] %v1976_v1  ;;  %551 = vmatprep.mubr.bf16.mxu0 %v1975_v0  ;;  %v2050_v3 = vld [vmem:[#allocation8] ss:$16 sps:$4 sm:$0xff]   ;;  %v2053_v4 = vld [vmem:[#allocation8 + $0x24] ss:$16 sps:$4 sm:$0xff]  }
  0x47   :  { %68 = vst [vmem:[#allocation2 + $0x10] sm:$0xff] %v1976_v1  ;;  %69 = vst [vmem:[#allocation2 + $0x18] sm:$0xff] %v1976_v1  ;;  %409 = vmatprep.subr.bf16.mxu1 %v2048_v2  ;;  %519 = vmatprep.subr.bf16.mxu0 %v2048_v2  ;;  %v2057_v5 = vld [vmem:[#allocation8 + $0x20] ss:$16 sps:$4 sm:$0xff]   ;;  %v2061_v6 = vld [vmem:[#allocation8 + $0x44] ss:$16 sps:$4 sm:$0xff]  }
  0x48   :  { %70 = vst [vmem:[#allocation2 + $0x20] sm:$0xff] %v1976_v1  ;;  %71 = vst [vmem:[#allocation2 + $0x28] sm:$0xff] %v1976_v1  ;;  %410 = vmatpush1.bf16.msra.mxu1 %v2050_v3  ;;  %520 = vmatpush1.bf16.msra.mxu0 %v2050_v3  ;;  %s2064_s3 = sld [smem:[#allocation5]]  ;;  %v2067_v7 = vld [vmem:[#allocation8 + $0x40] ss:$16 sps:$4 sm:$0xff]   ;;  %s2069_s9 = sld [smem:[#allocation5 + $0x1]] }
  0x49   :  { %72 = vst [vmem:[#allocation2 + $0x30] sm:$0xff] %v1976_v1  ;;  %73 = vst [vmem:[#allocation2 + $0x38] sm:$0xff] %v1976_v1  ;;  %411 = vmatprep.subr.bf16.mxu1 %v2053_v4  ;;  %521 = vmatprep.subr.bf16.mxu0 %v2053_v4  ;;  %v2073_v8 = vld [vmem:[#allocation8 + $0x64] ss:$16 sps:$4 sm:$0xff]   ;;  %v2077_v9 = vld [vmem:[#allocation8 + $0x60] ss:$16 sps:$4 sm:$0xff]  }
  0x4a   :  { %74 = vst [vmem:[#allocation2 + $0x40] sm:$0xff] %v1976_v1  ;;  %75 = vst [vmem:[#allocation2 + $0x48] sm:$0xff] %v1976_v1  ;;  %v2081_v10 = vld [vmem:[#allocation8 + $0x84] ss:$16 sps:$4 sm:$0xff]   ;;  %v2085_v11 = vld [vmem:[#allocation8 + $0x80] ss:$16 sps:$4 sm:$0xff]  }
  0x4b   :  { %76 = vst [vmem:[#allocation2 + $0x50] sm:$0xff] %v1976_v1  ;;  %77 = vst [vmem:[#allocation2 + $0x58] sm:$0xff] %v1976_v1  ;;  %v2091_v13 = vld [vmem:[#allocation8 + $0xa4] ss:$16 sps:$4 sm:$0xff]   ;;  %v2095_v14 = vld [vmem:[#allocation8 + $0xa0] ss:$16 sps:$4 sm:$0xff]  }
  0x4c   :  { %78 = vst [vmem:[#allocation2 + $0x60] sm:$0xff] %v1976_v1  ;;  %79 = vst [vmem:[#allocation2 + $0x68] sm:$0xff] %v1976_v1  ;;  %412 = vmatpush1.bf16.msra.mxu1 %v2057_v5  ;;  %522 = vmatpush1.bf16.msra.mxu0 %v2057_v5  ;;  %vm2097_vm0 = vcmp.lt.s32.totalorder %v102_v12, 512  ;;  %v2103_v16 = vld [vmem:[#allocation8 + $0xc4] ss:$16 sps:$4 sm:$0xff]   ;;  %s1569_s14 = sld [smem:[#allocation5 + $0x2]] }
  0x4d   :  { %80 = vst [vmem:[#allocation2 + $0x70] sm:$0xff] %v1976_v1  ;;  %81 = vst [vmem:[#allocation2 + $0x78] sm:$0xff] %v1976_v1  ;;  %413 = vmatprep.subr.bf16.mxu1 %v2061_v6  ;;  %523 = vmatprep.subr.bf16.mxu0 %v2061_v6  ;;  %v2106_v17 = vld [vmem:[#allocation8 + $0xc0] ss:$16 sps:$4 sm:$0xff]   ;;  %v2108_v20 = vld [vmem:[#allocation8 + $0xe4] ss:$16 sps:$4 sm:$0xff]  }
  0x4e   :  { %82 = vst [vmem:[#allocation2 + $0x80] sm:$0xff] %v1976_v1  ;;  %83 = vst [vmem:[#allocation2 + $0x88] sm:$0xff] %v1976_v1  ;;  %s1566_s10 = sshll.u32 %s2064_s3, 2  ;;  %s1568_s11 = sshll.u32 %s2069_s9, 2  ;;  %v2119_v21 = vld [vmem:[#allocation8 + $0xe0] ss:$16 sps:$4 sm:$0xff]  }
  0x4f   :  { %84 = vst [vmem:[#allocation2 + $0x90] sm:$0xff] %v1976_v1  ;;  %85 = vst [vmem:[#allocation2 + $0x98] sm:$0xff] %v1976_v1  ;;  %s100_s12 = scalar_lea.vmem [#allocation6], %s1566_s10  ;;  %s110_s13 = scalar_lea.vmem [#allocation6], %s1568_s11  ;;  %v2123_v22 = vld [vmem:[#allocation8 + $0xc] ss:$16 sps:$4 sm:$0xff]  }
  0x50   :  { %86 = vst [vmem:[#allocation2 + $0xa0] sm:$0xff] %v1976_v1  ;;  %87 = vst [vmem:[#allocation2 + $0xa8] sm:$0xff] %v1976_v1  ;;  %414 = vmatpush1.bf16.msra.mxu1 %v2067_v7  ;;  %524 = vmatpush1.bf16.msra.mxu0 %v2067_v7  ;;  %v101_v18 = vld [vmem:[%s100_s12] sm:$0xf]  ;;  %v2131_v24 = vld [vmem:[#allocation8 + $0x2c] ss:$16 sps:$4 sm:$0xff]  }
  0x51   :  { %88 = vst [vmem:[#allocation2 + $0xb0] sm:$0xff] %v1976_v1  ;;  %89 = vst [vmem:[#allocation2 + $0xb8] sm:$0xff] %v1976_v1  ;;  %415 = vmatprep.subr.bf16.mxu1 %v2073_v8  ;;  %525 = vmatprep.subr.bf16.mxu0 %v2073_v8  ;;  %v111_v19 = vld [vmem:[%s110_s13] sm:$0xf]  ;;  %v2140_v26 = vld [vmem:[#allocation8 + $0x4c] ss:$16 sps:$4 sm:$0xff]  }
  0x52   :  { %90 = vst [vmem:[#allocation2 + $0xc0] sm:$0xff] %v1976_v1  ;;  %91 = vst [vmem:[#allocation2 + $0xc8] sm:$0xff] %v1976_v1  ;;  %v2127_v23 = vld [vmem:[#allocation8 + $0x8] ss:$16 sps:$4 sm:$0xff]   ;;  %v2146_v28 = vld [vmem:[#allocation8 + $0x6c] ss:$16 sps:$4 sm:$0xff]  }
  0x53   :  { %92 = vst [vmem:[#allocation2 + $0xd0] sm:$0xff] %v1976_v1  ;;  %93 = vst [vmem:[#allocation2 + $0xd8] sm:$0xff] %v1976_v1  ;;  %v2136_v25 = vld [vmem:[#allocation8 + $0x28] ss:$16 sps:$4 sm:$0xff]   ;;  %v2152_v30 = vld [vmem:[#allocation8 + $0x8c] ss:$16 sps:$4 sm:$0xff]  }
  0x54   :  { %94 = vst [vmem:[#allocation2 + $0xe0] sm:$0xff] %v1976_v1  ;;  %95 = vst [vmem:[#allocation2 + $0xe8] sm:$0xff] %v1976_v1  ;;  %416 = vmatpush1.bf16.msra.mxu1 %v2077_v9  ;;  %526 = vmatpush1.bf16.msra.mxu0 %v2077_v9  ;;  %v2143_v27 = vld [vmem:[#allocation8 + $0x48] ss:$16 sps:$4 sm:$0xff]   ;;  %v2158_v32 = vld [vmem:[#allocation8 + $0xac] ss:$16 sps:$4 sm:$0xff]  }
  0x55   :  { %96 = vst [vmem:[#allocation2 + $0xf0] sm:$0xff] %v1976_v1  ;;  %97 = vst [vmem:[#allocation2 + $0xf8] sm:$0xff] %v1976_v1  ;;  %417 = vmatprep.subr.bf16.mxu1 %v2081_v10  ;;  %527 = vmatprep.subr.bf16.mxu0 %v2081_v10  ;;  %v2149_v29 = vld [vmem:[#allocation8 + $0x68] ss:$16 sps:$4 sm:$0xff]   ;;  %v2164_v34 = vld [vmem:[#allocation8 + $0xcc] ss:$16 sps:$4 sm:$0xff]  }
  0x56   :  { %106 = vst.msk [vmem:[#allocation2] ss:$8 sm:$0xf] %vm2097_vm0, %v101_v18  ;;  %113 = vst.msk [vmem:[#allocation2 + $0x1] ss:$8 sm:$0xf] %vm2097_vm0, %v111_v19 }
  0x57   :  { %v2155_v31 = vld [vmem:[#allocation8 + $0x88] ss:$16 sps:$4 sm:$0xff]   ;;  %v2170_v36 = vld [vmem:[#allocation8 + $0xec] ss:$16 sps:$4 sm:$0xff]   ;;  %s1571_s15 = sld [smem:[#allocation5 + $0x3]]  ;;  %s1570_s16 = sshll.u32 %s1569_s14, 2 }
  0x58   :  { %418 = vmatpush1.bf16.msra.mxu1 %v2085_v11  ;;  %528 = vmatpush1.bf16.msra.mxu0 %v2085_v11  ;;  %v2161_v33 = vld [vmem:[#allocation8 + $0xa8] ss:$16 sps:$4 sm:$0xff]   ;;  %s117_s18 = scalar_lea.vmem [#allocation6], %s1570_s16  ;;  %s1573_s20 = sld [smem:[#allocation5 + $0x4]] }
  0x59   :  { %419 = vmatprep.subr.bf16.mxu1 %v2091_v13  ;;  %529 = vmatprep.subr.bf16.mxu0 %v2091_v13  ;;  %v2167_v35 = vld [vmem:[#allocation8 + $0xc8] ss:$16 sps:$4 sm:$0xff]   ;;  %s1575_s2 = sld [smem:[#allocation5 + $0x5]]  ;;  %s1577_s25 = sld [smem:[#allocation5 + $0x6]] }
  0x5a   :  { %v2173_v37 = vld [vmem:[#allocation8 + $0xe8] ss:$16 sps:$4 sm:$0xff]   ;;  %s1579_s0 = sld [smem:[#allocation5 + $0x7]]  ;;  %s1581_s30 = sld [smem:[#allocation5 + $0x8]] }
  0x5b   :  { %v118_v38 = vld [vmem:[%s117_s18] sm:$0xf]  ;;  %s1583_s6 = sld [smem:[#allocation5 + $0x9]]  ;;  %s1585_s9 = sld [smem:[#allocation5 + $0xa]] }
  0x5c   :  { %420 = vmatpush1.bf16.msra.mxu1 %v2095_v14  ;;  %530 = vmatpush1.bf16.msra.mxu0 %v2095_v14  ;;  %120 = vst.msk [vmem:[#allocation2 + $0x20] ss:$8 sm:$0xf] %vm2097_vm0, %v118_v38  ;;  %s1587_s10 = sld [smem:[#allocation5 + $0xb]]  ;;  %s1591_s16 = sld [smem:[#allocation5 + $0xd]] }
  0x5d   :  { %421 = vmatprep.subr.bf16.mxu1 %v2103_v16  ;;  %531 = vmatprep.subr.bf16.mxu0 %v2103_v16  ;;  %s1572_s17 = sshll.u32 %s1571_s15, 2  ;;  %v246_v44 = vld [vmem:[#allocation2 + $0x8] sm:$0xff]  ;;  %v245_v45 = vld [vmem:[#allocation2] sm:$0xff]  ;;  %v247_v50 = vld [vmem:[#allocation2 + $0x10] sm:$0xff]  ;;  %s1589_s15 = sld [smem:[#allocation5 + $0xc]] }
  0x5e   :  { %s124_s19 = scalar_lea.vmem [#allocation6], %s1572_s17  ;;  %v248_v51 = vld [vmem:[#allocation2 + $0x18] sm:$0xff]  ;;  %s1574_s21 = sshll.u32 %s1573_s20, 2 }
  0x5f   :  { %v125_v39 = vld [vmem:[%s124_s19] sm:$0xf]  ;;  %s1576_s22 = sshll.u32 %s1575_s2, 2  ;;  %s131_s23 = scalar_lea.vmem [#allocation6], %s1574_s21 }
  0x60   :  { %422 = vmatpush1.bf16.msra.mxu1 %v2106_v17  ;;  %532 = vmatpush1.bf16.msra.mxu0 %v2106_v17  ;;  %127 = vst.msk [vmem:[#allocation2 + $0x21] ss:$8 sm:$0xf] %vm2097_vm0, %v125_v39  ;;  %s138_s24 = scalar_lea.vmem [#allocation6], %s1576_s22  ;;  %s1578_s26 = sshll.u32 %s1577_s25, 2 }
  0x61   :  { %423 = vmatprep.subr.bf16.mxu1 %v2108_v20  ;;  %533 = vmatprep.subr.bf16.mxu0 %v2108_v20  ;;  %s1580_s27 = sshll.u32 %s1579_s0, 2  ;;  %s145_s28 = scalar_lea.vmem [#allocation6], %s1578_s26 }
  0x62   :  { %s152_s29 = scalar_lea.vmem [#allocation6], %s1580_s27  ;;  %s1582_s7 = sshll.u32 %s1581_s30, 2 }
  0x63   :  { %s1584_s1 = sshll.u32 %s1583_s6, 2  ;;  %s159_s8 = scalar_lea.vmem [#allocation6], %s1582_s7 }
  0x64   :  { %424 = vmatpush1.bf16.msra.mxu1 %v2119_v21  ;;  %534 = vmatpush1.bf16.msra.mxu0 %v2119_v21  ;;  %s166_s3 = scalar_lea.vmem [#allocation6], %s1584_s1  ;;  %s1586_s11 = sshll.u32 %s1585_s9, 2 }
  0x65   :  { %450 = vmatprep.subr.bf16.mxu1 %v2123_v22  ;;  %629 = vmatprep.subr.bf16.mxu0 %v2048_v2  ;;  %s1588_s12 = sshll.u32 %s1587_s10, 2  ;;  %s173_s13 = scalar_lea.vmem [#allocation6], %s1586_s11 }
  0x66   :  { %s180_s14 = scalar_lea.vmem [#allocation6], %s1588_s12  ;;  %s1590_s17 = sshll.u32 %s1589_s15, 2 }
  0x67   :  { %442 = vmatmul.mubr.bf16.vlgmr.msra.gmra.mrb[0].mxu1 %v1975_v0  ;;  %s1592_s18 = sshll.u32 %s1591_s16, 2  ;;  %s187_s19 = scalar_lea.vmem [#allocation6], %s1590_s17 }
  0x68   :  { %451 = vmatpush1.bf16.msra.mxu1 %v2127_v23  ;;  %482 = vmatprep.mubr.bf16.mxu1 %v1975_v0  ;;  %s194_s20 = scalar_lea.vmem [#allocation6], %s1592_s18  ;;  %s1593_s2 = sld [smem:[#allocation5 + $0xe]] }
  0x69   :  { %452 = vmatprep.subr.bf16.mxu1 %v2131_v24  ;;  %s1595_s21 = sld [smem:[#allocation5 + $0xf]] }
  0x6c   :  { %453 = vmatpush1.bf16.msra.mxu1 %v2136_v25 }
  0x6d   :  { %454 = vmatprep.subr.bf16.mxu1 %v2140_v26 }
  0x6e   :  { %s1594_s22 = sshll.u32 %s1593_s2, 2 }
  0x70   :  { %455 = vmatpush1.bf16.msra.mxu1 %v2143_v27 }
  0x71   :  { %456 = vmatprep.subr.bf16.mxu1 %v2146_v28 }
  0x74   :  { %457 = vmatpush1.bf16.msra.mxu1 %v2149_v29 }
  0x75   :  { %458 = vmatprep.subr.bf16.mxu1 %v2152_v30 }
  0x78   :  { %459 = vmatpush1.bf16.msra.mxu1 %v2155_v31 }
  0x79   :  { %460 = vmatprep.subr.bf16.mxu1 %v2158_v32 }
  0x7c   :  { %461 = vmatpush1.bf16.msra.mxu1 %v2161_v33 }
  0x7d   :  { %462 = vmatprep.subr.bf16.mxu1 %v2164_v34 }
  0x80   :  { %463 = vmatpush1.bf16.msra.mxu1 %v2167_v35 }
  0x81   :  { %464 = vmatprep.subr.bf16.mxu1 %v2170_v36 }
  0x84   :  { %465 = vmatpush1.bf16.msra.mxu1 %v2173_v37 }
  0x85   :  { %560 = vmatprep.subr.bf16.mxu1 %v2123_v22 }
  0x87   :  { %483 = vmatmul.mubr.bf16.vlgmr.msra.gmra.mrb[4].mxu1 %v1975_v0 }
  0x88   :  { %561 = vmatpush1.bf16.msra.mxu1 %v2127_v23  ;;  %592 = vmatprep.mubr.bf16.mxu1 %v1975_v0 }
  0x89   :  { %562 = vmatprep.subr.bf16.mxu1 %v2131_v24 }
  0x8c   :  { %563 = vmatpush1.bf16.msra.mxu1 %v2136_v25 }
  0x8d   :  { %564 = vmatprep.subr.bf16.mxu1 %v2140_v26 }
  0x90   :  { %565 = vmatpush1.bf16.msra.mxu1 %v2143_v27 }
  0x91   :  { %566 = vmatprep.subr.bf16.mxu1 %v2146_v28 }
  0x94   :  { %567 = vmatpush1.bf16.msra.mxu1 %v2149_v29 }
  0x95   :  { %568 = vmatprep.subr.bf16.mxu1 %v2152_v30 }
  0x98   :  { %569 = vmatpush1.bf16.msra.mxu1 %v2155_v31 }
  0x99   :  { %570 = vmatprep.subr.bf16.mxu1 %v2158_v32 }
  0x9c   :  { %571 = vmatpush1.bf16.msra.mxu1 %v2161_v33 }
  0x9d   :  { %572 = vmatprep.subr.bf16.mxu1 %v2164_v34 }
  0xa0   :  { %573 = vmatpush1.bf16.msra.mxu1 %v2167_v35 }
  0xa1   :  { %574 = vmatprep.subr.bf16.mxu1 %v2170_v36 }
  0xa4   :  { %575 = vmatpush1.bf16.msra.mxu1 %v2173_v37 }
  0xa5   :  { %670 = vmatprep.subr.bf16.mxu1 %v2123_v22 }
 0x13a   :  { %v443_v40 = vpop.f32.mrb[0].mxu1 }
 0x13b   :  { %v445_v41 = vpop.f32.mrb[1].mxu1  ;;  %v491_v47 = vadd.f32 %v443_v40, %v245_v45  ;;  %v132_v45 = vld [vmem:[%s131_s23] sm:$0xf]  ;;  %s1596_s23 = sshll.u32 %s1595_s21, 2 }
 0x13c   :  { %v447_v42 = vpop.f32.mrb[2].mxu1  ;;  %v492_v46 = vadd.f32 %v445_v41, %v246_v44  ;;  %134 = vst.msk [vmem:[#allocation2 + $0x40] ss:$8 sm:$0xf] %vm2097_vm0, %v132_v45  ;;  %s208_s25 = scalar_lea.vmem [#allocation6], %s1596_s23 }
 0x13d   :  { %v448_v43 = vpop.f32.mrb[3].mxu1  ;;  %v495_v49 = vmul.f32 0.5, %v491_v47  ;;  %v514_v47 = vld [vmem:[#allocation2 + $0x20] sm:$0xff] }
 0x13e   :  { %v499_v48 = vmul.f32 0.5, %v492_v46  ;;  %v139_v46 = vld [vmem:[%s138_s24] sm:$0xf]  ;;  %s201_s24 = scalar_lea.vmem [#allocation6], %s1594_s22 }
 0x13f   :  { %141 = vst.msk [vmem:[#allocation2 + $0x41] ss:$8 sm:$0xf] %vm2097_vm0, %v139_v46 }
 0x140   :  { %1740 = vtanh.f32 %v499_v48  ;;  %v515_v48 = vld [vmem:[#allocation2 + $0x28] sm:$0xff] }
 0x141   :  { %1742 = vtanh.f32 %v495_v49 }
 0x14a   :  { %v1741_v57 = vpop.eup %1740 }
 0x14b   :  { %v1743_v59 = vpop.eup %1742  ;;  %v501_v60 = vadd.f32 1.0, %v1741_v57 }
 0x14c   :  { %v497_v62 = vadd.f32 1.0, %v1743_v59 }
 0x14d   :  { %v502_v63 = vmul.f32 0.5, %v501_v60 }
 0x14e   :  { %v498_v1 = vmul.f32 0.5, %v497_v62 }
 0x14f   :  { %v508_v18 = vmul.f32 0.0, %v502_v63  ;;  %v517_v63 = vld [vmem:[#allocation2 + $0x38] sm:$0xff] }
 0x15a   :  { %v484_v52 = vpop.f32.mrb[4].mxu1 }
 0x15b   :  { %v493_v53 = vadd.f32 %v484_v52, %v247_v50  ;;  %v486_v54 = vpop.f32.mrb[5].mxu1 }
 0x15c   :  { %v494_v55 = vadd.f32 %v486_v54, %v248_v51  ;;  %v488_v56 = vpop.f32.mrb[6].mxu1  ;;  %v516_v54 = vld [vmem:[#allocation2 + $0x30] sm:$0xff] }
 0x15d   :  { %1744 = vtanh.f32 %v493_v53  ;;  %v489_v58 = vpop.f32.mrb[7].mxu1 }
 0x15e   :  { %v504_v61 = vmul.f32 0.5, %v494_v55 }
 0x160   :  { %1746 = vtanh.f32 %v504_v61 }
 0x167   :  { %v1745_v12 = vpop.eup %1744 }
 0x168   :  { %v509_v19 = vmul.f32 %v1745_v12, %v498_v1 }
 0x16a   :  { %v2200_v38 = vadd.f32 %v509_v19, %v508_v18  ;;  %v1747_v39 = vpop.eup %1746 }
 0x16b   :  { %v506_v40 = vadd.f32 1.0, %v1747_v39 }
 0x16c   :  { %1748 = vtanh.f32 %v2200_v38 }
 0x16d   :  { %v507_v41 = vmul.f32 0.5, %v506_v40 }
 0x176   :  { %v1749_v42 = vpop.eup %1748 }
 0x177   :  { %v2203_v43 = vmul.f32 %v1749_v42, %v507_v41 }
 0x179   :  { %v518_v44 = vpack.c.bf16 %v2203_v43, %v2203_v43 }
 0x17b   :  { %552 = vmatmul.mubr.bf16.vlgmr.msra.gmra.mrb[0].mxu0 %v518_v44  ;;  %593 = vmatmul.mubr.bf16.vlgmr.msra.gmra.mrb[8].mxu1 %v518_v44 }
 0x17c   :  { %630 = vmatpush1.bf16.msra.mxu0 %v2050_v3  ;;  %671 = vmatpush1.bf16.msra.mxu1 %v2127_v23 }
 0x17d   :  { %631 = vmatprep.subr.bf16.mxu0 %v2053_v4  ;;  %672 = vmatprep.subr.bf16.mxu1 %v2131_v24 }
 0x17e   :  { %661 = vmatprep.mubr.bf16.mxu0 %v1975_v0  ;;  %702 = vmatprep.mubr.bf16.mxu1 %v1975_v0 }
 0x180   :  { %632 = vmatpush1.bf16.msra.mxu0 %v2057_v5  ;;  %673 = vmatpush1.bf16.msra.mxu1 %v2136_v25 }
 0x181   :  { %633 = vmatprep.subr.bf16.mxu0 %v2061_v6  ;;  %674 = vmatprep.subr.bf16.mxu1 %v2140_v26 }
 0x184   :  { %634 = vmatpush1.bf16.msra.mxu0 %v2067_v7  ;;  %675 = vmatpush1.bf16.msra.mxu1 %v2143_v27 }
 0x185   :  { %635 = vmatprep.subr.bf16.mxu0 %v2073_v8  ;;  %676 = vmatprep.subr.bf16.mxu1 %v2146_v28 }
 0x188   :  { %636 = vmatpush1.bf16.msra.mxu0 %v2077_v9  ;;  %677 = vmatpush1.bf16.msra.mxu1 %v2149_v29 }
 0x189   :  { %637 = vmatprep.subr.bf16.mxu0 %v2081_v10  ;;  %678 = vmatprep.subr.bf16.mxu1 %v2152_v30 }
 0x18c   :  { %638 = vmatpush1.bf16.msra.mxu0 %v2085_v11  ;;  %679 = vmatpush1.bf16.msra.mxu1 %v2155_v31 }
 0x18d   :  { %639 = vmatprep.subr.bf16.mxu0 %v2091_v13  ;;  %680 = vmatprep.subr.bf16.mxu1 %v2158_v32 }
 0x190   :  { %640 = vmatpush1.bf16.msra.mxu0 %v2095_v14  ;;  %681 = vmatpush1.bf16.msra.mxu1 %v2161_v33 }
 0x191   :  { %641 = vmatprep.subr.bf16.mxu0 %v2103_v16  ;;  %682 = vmatprep.subr.bf16.mxu1 %v2164_v34 }
 0x194   :  { %642 = vmatpush1.bf16.msra.mxu0 %v2106_v17  ;;  %683 = vmatpush1.bf16.msra.mxu1 %v2167_v35 }
 0x195   :  { %643 = vmatprep.subr.bf16.mxu0 %v2108_v20  ;;  %684 = vmatprep.subr.bf16.mxu1 %v2170_v36 }
 0x198   :  { %644 = vmatpush1.bf16.msra.mxu0 %v2119_v21  ;;  %685 = vmatpush1.bf16.msra.mxu1 %v2173_v37 }
 0x199   :  { %739 = vmatprep.subr.bf16.mxu0 %v2048_v2  ;;  %780 = vmatprep.subr.bf16.mxu1 %v2123_v22 }
 0x24e   :  { %v553_v49 = vpop.f32.mrb[0].mxu0  ;;  %v594_v50 = vpop.f32.mrb[8].mxu1 }
 0x24f   :  { %v601_v51 = vadd.f32 %v553_v49, %v514_v47  ;;  %v555_v52 = vpop.f32.mrb[1].mxu0  ;;  %v596_v53 = vpop.f32.mrb[9].mxu1  ;;  %v603_v62 = vadd.f32 %v594_v50, %v516_v54  ;;  %v153_v54 = vld [vmem:[%s152_s29] sm:$0xf] }
 0x250   :  { %v602_v55 = vadd.f32 %v555_v52, %v515_v48  ;;  %v557_v56 = vpop.f32.mrb[2].mxu0  ;;  %v598_v57 = vpop.f32.mrb[10].mxu1  ;;  %v604_v1 = vadd.f32 %v596_v53, %v517_v63  ;;  %155 = vst.msk [vmem:[#allocation2 + $0x61] ss:$8 sm:$0xf] %vm2097_vm0, %v153_v54 }
 0x251   :  { %v605_v58 = vmul.f32 0.5, %v601_v51  ;;  %v558_v59 = vpop.f32.mrb[3].mxu0  ;;  %v599_v60 = vpop.f32.mrb[11].mxu1  ;;  %v625_v56 = vld [vmem:[#allocation2 + $0x48] sm:$0xff] }
 0x252   :  { %v609_v61 = vmul.f32 0.5, %v602_v55  ;;  %v614_v12 = vmul.f32 0.5, %v604_v1  ;;  %v624_v55 = vld [vmem:[#allocation2 + $0x40] sm:$0xff] }
 0x253   :  { %1750 = vtanh.f32 %v605_v58 }
 0x254   :  { %1752 = vtanh.f32 %v609_v61 }
 0x255   :  { %1754 = vtanh.f32 %v603_v62  ;;  %v626_v62 = vld [vmem:[#allocation2 + $0x50] sm:$0xff] }
 0x256   :  { %1756 = vtanh.f32 %v614_v12 }
 0x25d   :  { %v1751_v18 = vpop.eup %1750 }
 0x25e   :  { %v1753_v19 = vpop.eup %1752  ;;  %v607_v39 = vadd.f32 1.0, %v1751_v18 }
 0x25f   :  { %v611_v40 = vadd.f32 1.0, %v1753_v19  ;;  %v1755_v42 = vpop.eup %1754 }
 0x260   :  { %v608_v41 = vmul.f32 0.5, %v607_v39  ;;  %v1757_v48 = vpop.eup %1756 }
 0x261   :  { %v612_v44 = vmul.f32 0.5, %v611_v40  ;;  %v616_v49 = vadd.f32 1.0, %v1757_v48 }
 0x262   :  { %v619_v45 = vmul.f32 %v1755_v42, %v608_v41  ;;  %v627_v42 = vld [vmem:[#allocation2 + $0x58] sm:$0xff] }
 0x263   :  { %v618_v46 = vmul.f32 %v612_v44, %v2200_v38  ;;  %v617_v50 = vmul.f32 0.5, %v616_v49  ;;  %v146_v38 = vld [vmem:[%s145_s28] sm:$0xf] }
 0x264   :  { %148 = vst.msk [vmem:[#allocation2 + $0x60] ss:$8 sm:$0xf] %vm2097_vm0, %v146_v38 }
 0x265   :  { %v2246_v47 = vadd.f32 %v619_v45, %v618_v46 }
 0x267   :  { %1758 = vtanh.f32 %v2246_v47 }
 0x271   :  { %v1759_v51 = vpop.eup %1758 }
 0x272   :  { %v2249_v52 = vmul.f32 %v1759_v51, %v617_v50 }
 0x274   :  { %v628_v53 = vpack.c.bf16 %v2249_v52, %v2249_v52 }
 0x276   :  { %662 = vmatmul.mubr.bf16.vlgmr.msra.gmra.mrb[4].mxu0 %v628_v53  ;;  %703 = vmatmul.mubr.bf16.vlgmr.msra.gmra.mrb[12].mxu1 %v628_v53 }
 0x277   :  { %740 = vmatpush1.bf16.msra.mxu0 %v2050_v3  ;;  %781 = vmatpush1.bf16.msra.mxu1 %v2127_v23 }
 0x278   :  { %741 = vmatprep.subr.bf16.mxu0 %v2053_v4  ;;  %782 = vmatprep.subr.bf16.mxu1 %v2131_v24 }
 0x279   :  { %771 = vmatprep.mubr.bf16.mxu0 %v1975_v0  ;;  %812 = vmatprep.mubr.bf16.mxu1 %v1975_v0 }
 0x27b   :  { %742 = vmatpush1.bf16.msra.mxu0 %v2057_v5  ;;  %783 = vmatpush1.bf16.msra.mxu1 %v2136_v25 }
 0x27c   :  { %743 = vmatprep.subr.bf16.mxu0 %v2061_v6  ;;  %784 = vmatprep.subr.bf16.mxu1 %v2140_v26 }
 0x27f   :  { %744 = vmatpush1.bf16.msra.mxu0 %v2067_v7  ;;  %785 = vmatpush1.bf16.msra.mxu1 %v2143_v27 }
 0x280   :  { %745 = vmatprep.subr.bf16.mxu0 %v2073_v8  ;;  %786 = vmatprep.subr.bf16.mxu1 %v2146_v28 }
 0x283   :  { %746 = vmatpush1.bf16.msra.mxu0 %v2077_v9  ;;  %787 = vmatpush1.bf16.msra.mxu1 %v2149_v29 }
 0x284   :  { %747 = vmatprep.subr.bf16.mxu0 %v2081_v10  ;;  %788 = vmatprep.subr.bf16.mxu1 %v2152_v30 }
 0x287   :  { %748 = vmatpush1.bf16.msra.mxu0 %v2085_v11  ;;  %789 = vmatpush1.bf16.msra.mxu1 %v2155_v31 }
 0x288   :  { %749 = vmatprep.subr.bf16.mxu0 %v2091_v13  ;;  %790 = vmatprep.subr.bf16.mxu1 %v2158_v32 }
 0x28b   :  { %750 = vmatpush1.bf16.msra.mxu0 %v2095_v14  ;;  %791 = vmatpush1.bf16.msra.mxu1 %v2161_v33 }
 0x28c   :  { %751 = vmatprep.subr.bf16.mxu0 %v2103_v16  ;;  %792 = vmatprep.subr.bf16.mxu1 %v2164_v34 }
 0x28f   :  { %752 = vmatpush1.bf16.msra.mxu0 %v2106_v17  ;;  %793 = vmatpush1.bf16.msra.mxu1 %v2167_v35 }
 0x290   :  { %753 = vmatprep.subr.bf16.mxu0 %v2108_v20  ;;  %794 = vmatprep.subr.bf16.mxu1 %v2170_v36 }
 0x293   :  { %754 = vmatpush1.bf16.msra.mxu0 %v2119_v21  ;;  %795 = vmatpush1.bf16.msra.mxu1 %v2173_v37 }
 0x294   :  { %849 = vmatprep.subr.bf16.mxu0 %v2048_v2  ;;  %890 = vmatprep.subr.bf16.mxu1 %v2123_v22 }
 0x349   :  { %v663_v57 = vpop.f32.mrb[4].mxu0  ;;  %v704_v58 = vpop.f32.mrb[12].mxu1 }
 0x34a   :  { %v711_v59 = vadd.f32 %v663_v57, %v624_v55  ;;  %v665_v60 = vpop.f32.mrb[5].mxu0  ;;  %v706_v61 = vpop.f32.mrb[13].mxu1  ;;  %v713_v41 = vadd.f32 %v704_v58, %v626_v62 }
 0x34b   :  { %v712_v63 = vadd.f32 %v665_v60, %v625_v56  ;;  %v667_v1 = vpop.f32.mrb[6].mxu0  ;;  %v708_v12 = vpop.f32.mrb[14].mxu1  ;;  %v714_v44 = vadd.f32 %v706_v61, %v627_v42  ;;  %v736_v42 = vld [vmem:[#allocation2 + $0x70] sm:$0xff] }
 0x34c   :  { %v715_v18 = vmul.f32 0.5, %v711_v59  ;;  %v668_v19 = vpop.f32.mrb[7].mxu0  ;;  %v709_v39 = vpop.f32.mrb[15].mxu1  ;;  %v734_v1 = vld [vmem:[#allocation2 + $0x60] sm:$0xff]  ;;  %v735_v12 = vld [vmem:[#allocation2 + $0x68] sm:$0xff] }
 0x34d   :  { %v719_v40 = vmul.f32 0.5, %v712_v63  ;;  %v724_v45 = vmul.f32 0.5, %v714_v44  ;;  %v167_v63 = vld [vmem:[%s166_s3] sm:$0xf] }
 0x34e   :  { %1760 = vtanh.f32 %v715_v18  ;;  %169 = vst.msk [vmem:[#allocation2 + $0x81] ss:$8 sm:$0xf] %vm2097_vm0, %v167_v63 }
 0x34f   :  { %1762 = vtanh.f32 %v719_v40 }
 0x350   :  { %1764 = vtanh.f32 %v713_v41 }
 0x351   :  { %1766 = vtanh.f32 %v724_v45 }
 0x358   :  { %v1761_v46 = vpop.eup %1760 }
 0x359   :  { %v1763_v48 = vpop.eup %1762  ;;  %v717_v49 = vadd.f32 1.0, %v1761_v46 }
 0x35a   :  { %v721_v50 = vadd.f32 1.0, %v1763_v48  ;;  %v1765_v53 = vpop.eup %1764 }
 0x35b   :  { %v718_v51 = vmul.f32 0.5, %v717_v49  ;;  %v1767_v57 = vpop.eup %1766 }
 0x35c   :  { %v722_v38 = vmul.f32 0.5, %v721_v50  ;;  %v726_v58 = vadd.f32 1.0, %v1767_v57 }
 0x35d   :  { %v729_v54 = vmul.f32 %v1765_v53, %v718_v51 }
 0x35e   :  { %v728_v55 = vmul.f32 %v722_v38, %v2246_v47  ;;  %v727_v59 = vmul.f32 0.5, %v726_v58  ;;  %v160_v47 = vld [vmem:[%s159_s8] sm:$0xf]  ;;  %v737_v38 = vld [vmem:[#allocation2 + $0x78] sm:$0xff] }
 0x35f   :  { %162 = vst.msk [vmem:[#allocation2 + $0x80] ss:$8 sm:$0xf] %vm2097_vm0, %v160_v47 }
 0x360   :  { %v2292_v56 = vadd.f32 %v729_v54, %v728_v55 }
 0x362   :  { %1768 = vtanh.f32 %v2292_v56 }
 0x36c   :  { %v1769_v60 = vpop.eup %1768 }
 0x36d   :  { %v2295_v61 = vmul.f32 %v1769_v60, %v727_v59 }
 0x36f   :  { %v738_v62 = vpack.c.bf16 %v2295_v61, %v2295_v61 }
 0x371   :  { %772 = vmatmul.mubr.bf16.vlgmr.msra.gmra.mrb[8].mxu0 %v738_v62  ;;  %813 = vmatmul.mubr.bf16.vlgmr.msra.gmra.mrb[16].mxu1 %v738_v62 }
 0x372   :  { %850 = vmatpush1.bf16.msra.mxu0 %v2050_v3  ;;  %891 = vmatpush1.bf16.msra.mxu1 %v2127_v23 }
 0x373   :  { %851 = vmatprep.subr.bf16.mxu0 %v2053_v4  ;;  %892 = vmatprep.subr.bf16.mxu1 %v2131_v24 }
 0x374   :  { %881 = vmatprep.mubr.bf16.mxu0 %v1975_v0  ;;  %922 = vmatprep.mubr.bf16.mxu1 %v1975_v0 }
 0x376   :  { %852 = vmatpush1.bf16.msra.mxu0 %v2057_v5  ;;  %893 = vmatpush1.bf16.msra.mxu1 %v2136_v25 }
 0x377   :  { %853 = vmatprep.subr.bf16.mxu0 %v2061_v6  ;;  %894 = vmatprep.subr.bf16.mxu1 %v2140_v26 }
 0x37a   :  { %854 = vmatpush1.bf16.msra.mxu0 %v2067_v7  ;;  %895 = vmatpush1.bf16.msra.mxu1 %v2143_v27 }
 0x37b   :  { %855 = vmatprep.subr.bf16.mxu0 %v2073_v8  ;;  %896 = vmatprep.subr.bf16.mxu1 %v2146_v28 }
 0x37e   :  { %856 = vmatpush1.bf16.msra.mxu0 %v2077_v9  ;;  %897 = vmatpush1.bf16.msra.mxu1 %v2149_v29 }
 0x37f   :  { %857 = vmatprep.subr.bf16.mxu0 %v2081_v10  ;;  %898 = vmatprep.subr.bf16.mxu1 %v2152_v30 }
 0x382   :  { %858 = vmatpush1.bf16.msra.mxu0 %v2085_v11  ;;  %899 = vmatpush1.bf16.msra.mxu1 %v2155_v31 }
 0x383   :  { %859 = vmatprep.subr.bf16.mxu0 %v2091_v13  ;;  %900 = vmatprep.subr.bf16.mxu1 %v2158_v32 }
 0x386   :  { %860 = vmatpush1.bf16.msra.mxu0 %v2095_v14  ;;  %901 = vmatpush1.bf16.msra.mxu1 %v2161_v33 }
 0x387   :  { %861 = vmatprep.subr.bf16.mxu0 %v2103_v16  ;;  %902 = vmatprep.subr.bf16.mxu1 %v2164_v34 }
 0x38a   :  { %862 = vmatpush1.bf16.msra.mxu0 %v2106_v17  ;;  %903 = vmatpush1.bf16.msra.mxu1 %v2167_v35 }
 0x38b   :  { %863 = vmatprep.subr.bf16.mxu0 %v2108_v20  ;;  %904 = vmatprep.subr.bf16.mxu1 %v2170_v36 }
 0x38e   :  { %864 = vmatpush1.bf16.msra.mxu0 %v2119_v21  ;;  %905 = vmatpush1.bf16.msra.mxu1 %v2173_v37 }
 0x38f   :  { %959 = vmatprep.subr.bf16.mxu0 %v2048_v2  ;;  %1000 = vmatprep.subr.bf16.mxu1 %v2123_v22 }
 0x444   :  { %v773_v18 = vpop.f32.mrb[8].mxu0  ;;  %v814_v19 = vpop.f32.mrb[16].mxu1 }
 0x445   :  { %v821_v39 = vadd.f32 %v773_v18, %v734_v1  ;;  %v775_v40 = vpop.f32.mrb[9].mxu0  ;;  %v816_v41 = vpop.f32.mrb[17].mxu1  ;;  %v823_v53 = vadd.f32 %v814_v19, %v736_v42 }
 0x446   :  { %v822_v44 = vadd.f32 %v775_v40, %v735_v12  ;;  %v777_v45 = vpop.f32.mrb[10].mxu0  ;;  %v818_v46 = vpop.f32.mrb[18].mxu1  ;;  %v824_v54 = vadd.f32 %v816_v41, %v737_v38 }
 0x447   :  { %v825_v48 = vmul.f32 0.5, %v821_v39  ;;  %v778_v49 = vpop.f32.mrb[11].mxu0  ;;  %v819_v50 = vpop.f32.mrb[19].mxu1 }
 0x448   :  { %v829_v51 = vmul.f32 0.5, %v822_v44  ;;  %v834_v55 = vmul.f32 0.5, %v824_v54  ;;  %v847_v50 = vld [vmem:[#allocation2 + $0x98] sm:$0xff] }
 0x449   :  { %1770 = vtanh.f32 %v825_v48 }
 0x44a   :  { %1772 = vtanh.f32 %v829_v51 }
 0x44b   :  { %1774 = vtanh.f32 %v823_v53 }
 0x44c   :  { %1776 = vtanh.f32 %v834_v55 }
 0x453   :  { %v1771_v57 = vpop.eup %1770 }
 0x454   :  { %v1773_v58 = vpop.eup %1772  ;;  %v827_v59 = vadd.f32 1.0, %v1771_v57 }
 0x455   :  { %v831_v60 = vadd.f32 1.0, %v1773_v58  ;;  %v1775_v47 = vpop.eup %1774 }
 0x456   :  { %v828_v62 = vmul.f32 0.5, %v827_v59  ;;  %v1777_v19 = vpop.eup %1776 }
 0x457   :  { %v832_v63 = vmul.f32 0.5, %v831_v60  ;;  %v836_v39 = vadd.f32 1.0, %v1777_v19 }
 0x458   :  { %v839_v1 = vmul.f32 %v1775_v47, %v828_v62 }
 0x459   :  { %v838_v12 = vmul.f32 %v832_v63, %v2292_v56  ;;  %v837_v40 = vmul.f32 0.5, %v836_v39 }
 0x45b   :  { %v2338_v18 = vadd.f32 %v839_v1, %v838_v12 }
 0x45d   :  { %1778 = vtanh.f32 %v2338_v18 }
 0x467   :  { %v1779_v41 = vpop.eup %1778 }
 0x468   :  { %v2341_v42 = vmul.f32 %v1779_v41, %v837_v40 }
 0x46a   :  { %v848_v44 = vpack.c.bf16 %v2341_v42, %v2341_v42 }
 0x46c   :  { %882 = vmatmul.mubr.bf16.vlgmr.msra.gmra.mrb[12].mxu0 %v848_v44  ;;  %923 = vmatmul.mubr.bf16.vlgmr.msra.gmra.mrb[20].mxu1 %v848_v44  ;;  %v2391_v44 = vld [vmem:[#allocation8] ss:$16 sps:$4 sm:$0xff]  }
 0x46d   :  { %960 = vmatpush1.bf16.msra.mxu0 %v2050_v3  ;;  %1001 = vmatpush1.bf16.msra.mxu1 %v2127_v23  ;;  %v174_v3 = vld [vmem:[%s173_s13] sm:$0xf] }
 0x46e   :  { %961 = vmatprep.subr.bf16.mxu0 %v2053_v4  ;;  %1002 = vmatprep.subr.bf16.mxu1 %v2131_v24  ;;  %v181_v4 = vld [vmem:[%s180_s14] sm:$0xf]  ;;  %176 = vst.msk [vmem:[#allocation2 + $0xa0] ss:$8 sm:$0xf] %vm2097_vm0, %v174_v3 }
 0x46f   :  { %991 = vmatprep.mubr.bf16.mxu0 %v1975_v0  ;;  %1032 = vmatprep.mubr.bf16.mxu1 %v1975_v0  ;;  %183 = vst.msk [vmem:[#allocation2 + $0xa1] ss:$8 sm:$0xf] %vm2097_vm0, %v181_v4  ;;  %v2401_v3 = vld [vmem:[#allocation8 + $0x20] ss:$16 sps:$4 sm:$0xff]  }
 0x470   :  { %v2405_v4 = vld [vmem:[#allocation8 + $0x44] ss:$16 sps:$4 sm:$0xff]  }
 0x471   :  { %962 = vmatpush1.bf16.msra.mxu0 %v2057_v5  ;;  %1003 = vmatpush1.bf16.msra.mxu1 %v2136_v25  ;;  %v844_v5 = vld [vmem:[#allocation2 + $0x80] sm:$0xff] }
 0x472   :  { %963 = vmatprep.subr.bf16.mxu0 %v2061_v6  ;;  %1004 = vmatprep.subr.bf16.mxu1 %v2140_v26  ;;  %v845_v6 = vld [vmem:[#allocation2 + $0x88] sm:$0xff] }
 0x475   :  { %964 = vmatpush1.bf16.msra.mxu0 %v2067_v7  ;;  %1005 = vmatpush1.bf16.msra.mxu1 %v2143_v27 }
 0x476   :  { %965 = vmatprep.subr.bf16.mxu0 %v2073_v8  ;;  %1006 = vmatprep.subr.bf16.mxu1 %v2146_v28 }
 0x479   :  { %966 = vmatpush1.bf16.msra.mxu0 %v2077_v9  ;;  %1007 = vmatpush1.bf16.msra.mxu1 %v2149_v29 }
 0x47a   :  { %967 = vmatprep.subr.bf16.mxu0 %v2081_v10  ;;  %1008 = vmatprep.subr.bf16.mxu1 %v2152_v30 }
 0x47d   :  { %968 = vmatpush1.bf16.msra.mxu0 %v2085_v11  ;;  %1009 = vmatpush1.bf16.msra.mxu1 %v2155_v31  ;;  %v846_v11 = vld [vmem:[#allocation2 + $0x90] sm:$0xff] }
 0x47e   :  { %969 = vmatprep.subr.bf16.mxu0 %v2091_v13  ;;  %1010 = vmatprep.subr.bf16.mxu1 %v2158_v32 }
 0x481   :  { %970 = vmatpush1.bf16.msra.mxu0 %v2095_v14  ;;  %1011 = vmatpush1.bf16.msra.mxu1 %v2161_v33 }
 0x482   :  { %971 = vmatprep.subr.bf16.mxu0 %v2103_v16  ;;  %1012 = vmatprep.subr.bf16.mxu1 %v2164_v34 }
 0x485   :  { %972 = vmatpush1.bf16.msra.mxu0 %v2106_v17  ;;  %1013 = vmatpush1.bf16.msra.mxu1 %v2167_v35 }
 0x486   :  { %973 = vmatprep.subr.bf16.mxu0 %v2108_v20  ;;  %1014 = vmatprep.subr.bf16.mxu1 %v2170_v36 }
 0x489   :  { %974 = vmatpush1.bf16.msra.mxu0 %v2119_v21  ;;  %1015 = vmatpush1.bf16.msra.mxu1 %v2173_v37 }
 0x48a   :  { %1069 = vmatprep.subr.bf16.mxu0 %v2048_v2  ;;  %1110 = vmatprep.subr.bf16.mxu1 %v2123_v22 }
 0x53f   :  { %v883_v7 = vpop.f32.mrb[12].mxu0  ;;  %v924_v2 = vpop.f32.mrb[20].mxu1 }
 0x540   :  { %v931_v8 = vadd.f32 %v883_v7, %v844_v5  ;;  %v885_v9 = vpop.f32.mrb[13].mxu0  ;;  %v926_v10 = vpop.f32.mrb[21].mxu1  ;;  %v933_v49 = vadd.f32 %v924_v2, %v846_v11  ;;  %v2417_v5 = vld [vmem:[#allocation8 + $0x60] ss:$16 sps:$4 sm:$0xff]  }
 0x541   :  { %v932_v13 = vadd.f32 %v885_v9, %v845_v6  ;;  %v887_v14 = vpop.f32.mrb[14].mxu0  ;;  %v928_v16 = vpop.f32.mrb[22].mxu1  ;;  %v934_v51 = vadd.f32 %v926_v10, %v847_v50 }
 0x542   :  { %v935_v56 = vmul.f32 0.5, %v931_v8  ;;  %v888_v45 = vpop.f32.mrb[15].mxu0  ;;  %v929_v46 = vpop.f32.mrb[23].mxu1 }
 0x543   :  { %v939_v48 = vmul.f32 0.5, %v932_v13  ;;  %v944_v53 = vmul.f32 0.5, %v934_v51  ;;  %v957_v13 = vld [vmem:[#allocation2 + $0xb8] sm:$0xff] }
 0x544   :  { %1780 = vtanh.f32 %v935_v56 }
 0x545   :  { %1782 = vtanh.f32 %v939_v48 }
 0x546   :  { %1784 = vtanh.f32 %v933_v49 }
 0x547   :  { %1786 = vtanh.f32 %v944_v53 }
 0x54e   :  { %v1781_v38 = vpop.eup %1780 }
 0x54f   :  { %v1783_v54 = vpop.eup %1782  ;;  %v937_v55 = vadd.f32 1.0, %v1781_v38 }
 0x550   :  { %v941_v57 = vadd.f32 1.0, %v1783_v54  ;;  %v1785_v59 = vpop.eup %1784 }
 0x551   :  { %v938_v58 = vmul.f32 0.5, %v937_v55  ;;  %v1787_v1 = vpop.eup %1786 }
 0x552   :  { %v942_v60 = vmul.f32 0.5, %v941_v57  ;;  %v946_v12 = vadd.f32 1.0, %v1787_v1  ;;  %v1867_v1 = vld [vmem:[#allocation8 + $0x28] ss:$16 sps:$4 sm:$0xff]  }
 0x553   :  { %v949_v62 = vmul.f32 %v1785_v59, %v938_v58 }
 0x554   :  { %v948_v47 = vmul.f32 %v942_v60, %v2338_v18  ;;  %v947_v19 = vmul.f32 0.5, %v946_v12  ;;  %v2395_v18 = vld [vmem:[#allocation8 + $0x24] ss:$16 sps:$4 sm:$0xff]   ;;  %v1868_v12 = vld [vmem:[#allocation8 + $0x4c] ss:$16 sps:$4 sm:$0xff]  }
 0x556   :  { %v2384_v63 = vadd.f32 %v949_v62, %v948_v47  ;;  %v1865_v47 = vld [vmem:[#allocation8 + $0x8] ss:$16 sps:$4 sm:$0xff]  }
 0x558   :  { %1788 = vtanh.f32 %v2384_v63 }
 0x562   :  { %v1789_v39 = vpop.eup %1788 }
 0x563   :  { %v2387_v40 = vmul.f32 %v1789_v39, %v947_v19  ;;  %v1869_v19 = vld [vmem:[#allocation8 + $0x48] ss:$16 sps:$4 sm:$0xff]   ;;  %v1870_v39 = vld [vmem:[#allocation8 + $0x6c] ss:$16 sps:$4 sm:$0xff]  }
 0x565   :  { %v958_v41 = vpack.c.bf16 %v2387_v40, %v2387_v40 }
 0x567   :  { %992 = vmatmul.mubr.bf16.vlgmr.msra.gmra.mrb[16].mxu0 %v958_v41  ;;  %1033 = vmatmul.mubr.bf16.vlgmr.msra.gmra.mrb[24].mxu1 %v958_v41  ;;  %v1871_v41 = vld [vmem:[#allocation8 + $0x68] ss:$16 sps:$4 sm:$0xff]  }
 0x568   :  { %1070 = vmatpush1.bf16.msra.mxu0 %v2391_v44  ;;  %1111 = vmatpush1.bf16.msra.mxu1 %v2127_v23  ;;  %v2409_v23 = vld [vmem:[#allocation8 + $0x40] ss:$16 sps:$4 sm:$0xff]  }
 0x569   :  { %1071 = vmatprep.subr.bf16.mxu0 %v2395_v18  ;;  %1112 = vmatprep.subr.bf16.mxu1 %v2131_v24  ;;  %v2413_v24 = vld [vmem:[#allocation8 + $0x64] ss:$16 sps:$4 sm:$0xff]  }
 0x56a   :  { %1101 = vmatprep.mubr.bf16.mxu0 %v1975_v0  ;;  %1142 = vmatprep.mubr.bf16.mxu1 %v1975_v0 }
 0x56c   :  { %1072 = vmatpush1.bf16.msra.mxu0 %v2401_v3  ;;  %1113 = vmatpush1.bf16.msra.mxu1 %v2136_v25  ;;  %v2421_v25 = vld [vmem:[#allocation8 + $0x84] ss:$16 sps:$4 sm:$0xff]  }
 0x56d   :  { %1073 = vmatprep.subr.bf16.mxu0 %v2405_v4  ;;  %1114 = vmatprep.subr.bf16.mxu1 %v2140_v26  ;;  %v2425_v26 = vld [vmem:[#allocation8 + $0x80] ss:$16 sps:$4 sm:$0xff]  }
 0x570   :  { %1074 = vmatpush1.bf16.msra.mxu0 %v2409_v23  ;;  %1115 = vmatpush1.bf16.msra.mxu1 %v2143_v27  ;;  %v2429_v27 = vld [vmem:[#allocation8 + $0xa4] ss:$16 sps:$4 sm:$0xff]  }
 0x571   :  { %1075 = vmatprep.subr.bf16.mxu0 %v2413_v24  ;;  %1116 = vmatprep.subr.bf16.mxu1 %v2146_v28  ;;  %v2433_v28 = vld [vmem:[#allocation8 + $0xa0] ss:$16 sps:$4 sm:$0xff]  }
 0x574   :  { %1076 = vmatpush1.bf16.msra.mxu0 %v2417_v5  ;;  %1117 = vmatpush1.bf16.msra.mxu1 %v2149_v29  ;;  %v2437_v29 = vld [vmem:[#allocation8 + $0xc4] ss:$16 sps:$4 sm:$0xff]  }
 0x575   :  { %1077 = vmatprep.subr.bf16.mxu0 %v2421_v25  ;;  %1118 = vmatprep.subr.bf16.mxu1 %v2152_v30  ;;  %v1864_v30 = vld [vmem:[#allocation8 + $0x4] ss:$16 sps:$4 sm:$0xff]  }
 0x578   :  { %1078 = vmatpush1.bf16.msra.mxu0 %v2425_v26  ;;  %1119 = vmatpush1.bf16.msra.mxu1 %v2155_v31  ;;  %v195_v31 = vld [vmem:[%s194_s20] sm:$0xf] }
 0x579   :  { %1079 = vmatprep.subr.bf16.mxu0 %v2429_v27  ;;  %1120 = vmatprep.subr.bf16.mxu1 %v2158_v32  ;;  %197 = vst.msk [vmem:[#allocation2 + $0xc1] ss:$8 sm:$0xf] %vm2097_vm0, %v195_v31 }
 0x57c   :  { %1080 = vmatpush1.bf16.msra.mxu0 %v2433_v28  ;;  %1121 = vmatpush1.bf16.msra.mxu1 %v2161_v33 }
 0x57d   :  { %1081 = vmatprep.subr.bf16.mxu0 %v2437_v29  ;;  %1122 = vmatprep.subr.bf16.mxu1 %v2164_v34 }
 0x580   :  { %1082 = vmatpush1.bf16.msra.mxu0 %v2106_v17  ;;  %1123 = vmatpush1.bf16.msra.mxu1 %v2167_v35  ;;  %v188_v17 = vld [vmem:[%s187_s19] sm:$0xf] }
 0x581   :  { %1083 = vmatprep.subr.bf16.mxu0 %v2108_v20  ;;  %1124 = vmatprep.subr.bf16.mxu1 %v2170_v36  ;;  %190 = vst.msk [vmem:[#allocation2 + $0xc0] ss:$8 sm:$0xf] %vm2097_vm0, %v188_v17  ;;  %v954_v20 = vld [vmem:[#allocation2 + $0xa0] sm:$0xff]  ;;  %v956_v36 = vld [vmem:[#allocation2 + $0xb0] sm:$0xff] }
 0x584   :  { %1084 = vmatpush1.bf16.msra.mxu0 %v2119_v21  ;;  %1125 = vmatpush1.bf16.msra.mxu1 %v2173_v37  ;;  %v955_v21 = vld [vmem:[#allocation2 + $0xa8] sm:$0xff] }
 0x585   :  { %1179 = vmatprep.subr.bf16.mxu0 %v1864_v30  ;;  %1220 = vmatprep.subr.bf16.mxu1 %v2123_v22  ;;  %v1732_v30 = vld [vmem:[#allocation10] sm:$0xff]  }
 0x588   :  { %v1064_v17 = vld [vmem:[#allocation2 + $0xc0] sm:$0xff]  ;;  %v1065_v31 = vld [vmem:[#allocation2 + $0xc8] sm:$0xff]  ;;  %v1067_v15 = vld [vmem:[#allocation2 + $0xd8] sm:$0xff] }
 0x63a   :  { %v993_v32 = vpop.f32.mrb[16].mxu0  ;;  %v1034_v33 = vpop.f32.mrb[24].mxu1 }
 0x63b   :  { %v1041_v34 = vadd.f32 %v993_v32, %v954_v20  ;;  %v995_v22 = vpop.f32.mrb[17].mxu0  ;;  %v1036_v35 = vpop.f32.mrb[25].mxu1  ;;  %v1043_v11 = vadd.f32 %v1034_v33, %v956_v36 }
 0x63c   :  { %v1042_v37 = vadd.f32 %v995_v22, %v955_v21  ;;  %v997_v6 = vpop.f32.mrb[18].mxu0  ;;  %v1038_v7 = vpop.f32.mrb[26].mxu1  ;;  %v1044_v14 = vadd.f32 %v1036_v35, %v957_v13  ;;  %v1066_v22 = vld [vmem:[#allocation2 + $0xd0] sm:$0xff] }
 0x63d   :  { %v1045_v2 = vmul.f32 0.5, %v1041_v34  ;;  %v998_v8 = vpop.f32.mrb[19].mxu0  ;;  %v1039_v9 = vpop.f32.mrb[27].mxu1 }
 0x63e   :  { %v1049_v10 = vmul.f32 0.5, %v1042_v37  ;;  %v1054_v16 = vmul.f32 0.5, %v1044_v14 }
 0x63f   :  { %1790 = vtanh.f32 %v1045_v2 }
 0x640   :  { %1792 = vtanh.f32 %v1049_v10 }
 0x641   :  { %1794 = vtanh.f32 %v1043_v11 }
 0x642   :  { %1796 = vtanh.f32 %v1054_v16 }
 0x649   :  { %v1791_v56 = vpop.eup %1790 }
 0x64a   :  { %v1793_v45 = vpop.eup %1792  ;;  %v1047_v46 = vadd.f32 1.0, %v1791_v56 }
 0x64b   :  { %v1051_v48 = vadd.f32 1.0, %v1793_v45  ;;  %v1795_v50 = vpop.eup %1794 }
 0x64c   :  { %v1048_v49 = vmul.f32 0.5, %v1047_v46  ;;  %v1797_v55 = vpop.eup %1796 }
 0x64d   :  { %v1052_v51 = vmul.f32 0.5, %v1051_v48  ;;  %v1056_v57 = vadd.f32 1.0, %v1797_v55 }
 0x64e   :  { %v1059_v53 = vmul.f32 %v1795_v50, %v1048_v49 }
 0x64f   :  { %v1058_v38 = vmul.f32 %v1052_v51, %v2384_v63  ;;  %v1057_v58 = vmul.f32 0.5, %v1056_v57  ;;  %v1866_v63 = vld [vmem:[#allocation8 + $0x2c] ss:$16 sps:$4 sm:$0xff]  }
 0x651   :  { %v2453_v54 = vadd.f32 %v1059_v53, %v1058_v38 }
 0x653   :  { %1798 = vtanh.f32 %v2453_v54 }
 0x65d   :  { %v1799_v59 = vpop.eup %1798 }
 0x65e   :  { %v2456_v60 = vmul.f32 %v1799_v59, %v1057_v58 }
 0x660   :  { %v1068_v62 = vpack.c.bf16 %v2456_v60, %v2456_v60 }
 0x662   :  { %1102 = vmatmul.mubr.bf16.vlgmr.msra.gmra.mrb[20].mxu0 %v1068_v62  ;;  %1143 = vmatmul.mubr.bf16.vlgmr.msra.gmra.mrb[28].mxu1 %v1068_v62  ;;  %v1733_v62 = vld [vmem:[#allocation10 + $0x8] sm:$0xff]  }
 0x663   :  { %1180 = vmatpush1.bf16.msra.mxu0 %v2391_v44  ;;  %1221 = vmatpush1.bf16.msra.mxu1 %v1865_v47  ;;  %v1873_v44 = vld [vmem:[#allocation8 + $0x88] ss:$16 sps:$4 sm:$0xff]   ;;  %v1292_v47 = vpack.c.bf16 %v2249_v52, %v2203_v43  ;;  %v1293_v52 = vpack.c.bf16 %v2341_v42, %v2295_v61 }
 0x664   :  { %1181 = vmatprep.subr.bf16.mxu0 %v2395_v18  ;;  %1222 = vmatprep.subr.bf16.mxu1 %v1866_v63  ;;  %v1874_v18 = vld [vmem:[#allocation8 + $0xac] ss:$16 sps:$4 sm:$0xff]  }
 0x665   :  { %1211 = vmatprep.mubr.bf16.mxu0 %v1975_v0  ;;  %1252 = vmatprep.mubr.bf16.mxu1 %v1975_v0  ;;  %v1872_v0 = vld [vmem:[#allocation8 + $0x8c] ss:$16 sps:$4 sm:$0xff]  }
 0x666   :  { %v1735_v63 = vld [vmem:[#allocation10 + $0x18] sm:$0xff]  }
 0x667   :  { %1182 = vmatpush1.bf16.msra.mxu0 %v2401_v3  ;;  %1223 = vmatpush1.bf16.msra.mxu1 %v1867_v1  ;;  %v1875_v3 = vld [vmem:[#allocation8 + $0xa8] ss:$16 sps:$4 sm:$0xff]   ;;  %v1736_v1 = vld [vmem:[#allocation10 + $0x20] sm:$0xff]  }
 0x668   :  { %1183 = vmatprep.subr.bf16.mxu0 %v2405_v4  ;;  %1224 = vmatprep.subr.bf16.mxu1 %v1868_v12  ;;  %v1876_v4 = vld [vmem:[#allocation8 + $0xcc] ss:$16 sps:$4 sm:$0xff]  }
 0x669   :  { %v1737_v12 = vld [vmem:[#allocation10 + $0x28] sm:$0xff]   ;;  %v1739_v43 = vld [vmem:[#allocation10 + $0x38] sm:$0xff]  }
 0x66b   :  { %1184 = vmatpush1.bf16.msra.mxu0 %v2409_v23  ;;  %1225 = vmatpush1.bf16.msra.mxu1 %v1869_v19  ;;  %v1877_v23 = vld [vmem:[#allocation8 + $0xc0] ss:$16 sps:$4 sm:$0xff]  }
 0x66c   :  { %1185 = vmatprep.subr.bf16.mxu0 %v2413_v24  ;;  %1226 = vmatprep.subr.bf16.mxu1 %v1870_v39  ;;  %v1878_v24 = vld [vmem:[#allocation8 + $0xc8] ss:$16 sps:$4 sm:$0xff]   ;;  %v1738_v19 = vld [vmem:[#allocation10 + $0x30] sm:$0xff]   ;;  %v1294_v39 = vpack.c.bf16 %v2456_v60, %v2387_v40 }
 0x66f   :  { %1186 = vmatpush1.bf16.msra.mxu0 %v2417_v5  ;;  %1227 = vmatpush1.bf16.msra.mxu1 %v1871_v41  ;;  %v1879_v5 = vld [vmem:[#allocation8 + $0xe4] ss:$16 sps:$4 sm:$0xff]  }
 0x670   :  { %1187 = vmatprep.subr.bf16.mxu0 %v2421_v25  ;;  %1228 = vmatprep.subr.bf16.mxu1 %v1872_v0  ;;  %v1880_v25 = vld [vmem:[#allocation8 + $0xec] ss:$16 sps:$4 sm:$0xff]  }
 0x673   :  { %1188 = vmatpush1.bf16.msra.mxu0 %v2425_v26  ;;  %1229 = vmatpush1.bf16.msra.mxu1 %v1873_v44  ;;  %v1881_v26 = vld [vmem:[#allocation8 + $0xe0] ss:$16 sps:$4 sm:$0xff]  }
 0x674   :  { %1189 = vmatprep.subr.bf16.mxu0 %v2429_v27  ;;  %1230 = vmatprep.subr.bf16.mxu1 %v1874_v18  ;;  %v1882_v27 = vld [vmem:[#allocation8 + $0xe8] ss:$16 sps:$4 sm:$0xff]  }
 0x677   :  { %1190 = vmatpush1.bf16.msra.mxu0 %v2433_v28  ;;  %1231 = vmatpush1.bf16.msra.mxu1 %v1875_v3  ;;  %v202_v28 = vld [vmem:[%s201_s24] sm:$0xf] }
 0x678   :  { %1191 = vmatprep.subr.bf16.mxu0 %v2437_v29  ;;  %1232 = vmatprep.subr.bf16.mxu1 %v1876_v4  ;;  %v209_v29 = vld [vmem:[%s208_s25] sm:$0xf]  ;;  %204 = vst.msk [vmem:[#allocation2 + $0xe0] ss:$8 sm:$0xf] %vm2097_vm0, %v202_v28 }
 0x679   :  { %211 = vst.msk [vmem:[#allocation2 + $0xe1] ss:$8 sm:$0xf] %vm2097_vm0, %v209_v29 }
 0x67b   :  { %1192 = vmatpush1.bf16.msra.mxu0 %v1877_v23  ;;  %1233 = vmatpush1.bf16.msra.mxu1 %v1878_v24 }
 0x67c   :  { %1193 = vmatprep.subr.bf16.mxu0 %v1879_v5  ;;  %1234 = vmatprep.subr.bf16.mxu1 %v1880_v25 }
 0x67f   :  { %1194 = vmatpush1.bf16.msra.mxu0 %v1881_v26  ;;  %1235 = vmatpush1.bf16.msra.mxu1 %v1882_v27 }
 0x680   :  { %1650 = vmatprep.subr.bf16.mxu0 %v1732_v30  ;;  %v1174_v41 = vld [vmem:[#allocation2 + $0xe0] sm:$0xff]  ;;  %v1175_v0 = vld [vmem:[#allocation2 + $0xe8] sm:$0xff]  ;;  %v1176_v24 = vld [vmem:[#allocation2 + $0xf0] sm:$0xff] }
 0x681   :  { %v1177_v40 = vld [vmem:[#allocation2 + $0xf8] sm:$0xff] }
 0x735   :  { %v1103_v20 = vpop.f32.mrb[20].mxu0  ;;  %v1144_v21 = vpop.f32.mrb[28].mxu1 }
 0x736   :  { %v1151_v32 = vadd.f32 %v1103_v20, %v1064_v17  ;;  %v1105_v33 = vpop.f32.mrb[21].mxu0  ;;  %v1146_v34 = vpop.f32.mrb[29].mxu1  ;;  %v1153_v9 = vadd.f32 %v1144_v21, %v1066_v22 }
 0x737   :  { %v1152_v35 = vadd.f32 %v1105_v33, %v1065_v31  ;;  %v1107_v36 = vpop.f32.mrb[22].mxu0  ;;  %v1148_v37 = vpop.f32.mrb[30].mxu1  ;;  %v1154_v10 = vadd.f32 %v1146_v34, %v1067_v15 }
 0x738   :  { %v1155_v6 = vmul.f32 0.5, %v1151_v32  ;;  %v1108_v7 = vpop.f32.mrb[23].mxu0  ;;  %v1149_v2 = vpop.f32.mrb[31].mxu1 }
 0x739   :  { %v1159_v8 = vmul.f32 0.5, %v1152_v35  ;;  %v1164_v11 = vmul.f32 0.5, %v1154_v10  ;;  %v1629_v7 = vld [vmem:[%s2597_s4] ss:$0 sm:$0xff] }
 0x73a   :  { %1800 = vtanh.f32 %v1155_v6 }
 0x73b   :  { %1802 = vtanh.f32 %v1159_v8 }
 0x73c   :  { %1804 = vtanh.f32 %v1153_v9 }
 0x73d   :  { %1806 = vtanh.f32 %v1164_v11 }
 0x744   :  { %v1801_v13 = vpop.eup %1800 }
 0x745   :  { %v1803_v14 = vpop.eup %1802  ;;  %v1157_v16 = vadd.f32 1.0, %v1801_v13 }
 0x746   :  { %v1161_v56 = vadd.f32 1.0, %v1803_v14  ;;  %v1805_v46 = vpop.eup %1804 }
 0x747   :  { %v1158_v45 = vmul.f32 0.5, %v1157_v16  ;;  %v1807_v53 = vpop.eup %1806 }
 0x748   :  { %v1162_v48 = vmul.f32 0.5, %v1161_v56  ;;  %v1166_v38 = vadd.f32 1.0, %v1807_v53 }
 0x749   :  { %v1169_v49 = vmul.f32 %v1805_v46, %v1158_v45 }
 0x74a   :  { %v1168_v50 = vmul.f32 %v1162_v48, %v2453_v54  ;;  %v1167_v55 = vmul.f32 0.5, %v1166_v38  ;;  %v1734_v54 = vld [vmem:[#allocation10 + $0x10] sm:$0xff]  }
 0x74c   :  { %v2479_v51 = vadd.f32 %v1169_v49, %v1168_v50 }
 0x74e   :  { %1808 = vtanh.f32 %v2479_v51 }
 0x758   :  { %v1809_v57 = vpop.eup %1808 }
 0x759   :  { %v2482_v58 = vmul.f32 %v1809_v57, %v1167_v55 }
 0x75b   :  { %v1178_v59 = vpack.c.bf16 %v2482_v58, %v2482_v58 }
 0x75d   :  { %1212 = vmatmul.mubr.bf16.vlgmr.msra.gmra.mrb[24].mxu0 %v1178_v59  ;;  %1253 = vmatmul.mubr.bf16.vlgmr.msra.gmra.mrb[32].mxu1 %v1178_v59 }
 0x75e   :  { %1651 = vmatpush3.bf16.msra.mxu0 %v1732_v30  ;;  %1666 = vmatprep.mubr.bf16.mxu0 %v1292_v47 }
 0x75f   :  { %1652 = vmatprep.subr.bf16.mxu0 %v1733_v62 }
 0x762   :  { %1653 = vmatpush3.bf16.msra.mxu0 %v1733_v62 }
 0x763   :  { %1654 = vmatprep.subr.bf16.mxu0 %v1734_v54 }
 0x766   :  { %1655 = vmatpush3.bf16.msra.mxu0 %v1734_v54 }
 0x767   :  { %1656 = vmatprep.subr.bf16.mxu0 %v1735_v63 }
 0x76a   :  { %1657 = vmatpush3.bf16.msra.mxu0 %v1735_v63 }
 0x76b   :  { %1658 = vmatprep.subr.bf16.mxu0 %v1736_v1 }
 0x76e   :  { %1659 = vmatpush3.bf16.msra.mxu0 %v1736_v1 }
 0x76f   :  { %1660 = vmatprep.subr.bf16.mxu0 %v1737_v12 }
 0x772   :  { %1661 = vmatpush3.bf16.msra.mxu0 %v1737_v12 }
 0x773   :  { %1662 = vmatprep.subr.bf16.mxu0 %v1738_v19 }
 0x776   :  { %1663 = vmatpush3.bf16.msra.mxu0 %v1738_v19 }
 0x777   :  { %1664 = vmatprep.subr.bf16.mxu0 %v1739_v43 }
 0x77a   :  { %1665 = vmatpush3.bf16.msra.mxu0 %v1739_v43 }
 0x77d   :  { %1667 = vmatmul.mubr.bf16.vlgmr.msra.gmra.mrb[28].mxu0 %v1293_v52 }
 0x77e   :  { %1670 = vmatprep.mubr.bf16.mxu0 %v1294_v39 }
 0x830   :  { %v1213_v44 = vpop.f32.mrb[24].mxu0  ;;  %v1254_v18 = vpop.f32.mrb[32].mxu1 }
 0x831   :  { %v1261_v3 = vadd.f32 %v1213_v44, %v1174_v41  ;;  %v1215_v4 = vpop.f32.mrb[25].mxu0  ;;  %v1256_v23 = vpop.f32.mrb[33].mxu1  ;;  %v1263_v42 = vadd.f32 %v1254_v18, %v1176_v24 }
 0x832   :  { %v1262_v5 = vadd.f32 %v1215_v4, %v1175_v0  ;;  %v1217_v25 = vpop.f32.mrb[26].mxu0  ;;  %v1258_v26 = vpop.f32.mrb[34].mxu1  ;;  %v1264_v60 = vadd.f32 %v1256_v23, %v1177_v40 }
 0x833   :  { %v1265_v27 = vmul.f32 0.5, %v1261_v3  ;;  %v1218_v30 = vpop.f32.mrb[27].mxu0  ;;  %v1259_v28 = vpop.f32.mrb[35].mxu1 }
 0x834   :  { %v1269_v61 = vmul.f32 0.5, %v1262_v5  ;;  %v1274_v29 = vmul.f32 0.5, %v1264_v60 }
 0x835   :  { %1810 = vtanh.f32 %v1265_v27 }
 0x836   :  { %1812 = vtanh.f32 %v1269_v61 }
 0x837   :  { %1814 = vtanh.f32 %v1263_v42 }
 0x838   :  { %1816 = vtanh.f32 %v1274_v29 }
 0x83f   :  { %v1811_v17 = vpop.eup %1810 }
 0x840   :  { %v1813_v31 = vpop.eup %1812  ;;  %v1267_v20 = vadd.f32 1.0, %v1811_v17 }
 0x841   :  { %v1271_v21 = vadd.f32 1.0, %v1813_v31  ;;  %v1815_v33 = vpop.eup %1814 }
 0x842   :  { %v1268_v32 = vmul.f32 0.5, %v1267_v20  ;;  %v1817_v37 = vpop.eup %1816 }
 0x843   :  { %v1272_v34 = vmul.f32 0.5, %v1271_v21  ;;  %v1276_v6 = vadd.f32 1.0, %v1817_v37 }
 0x844   :  { %v1279_v22 = vmul.f32 %v1815_v33, %v1268_v32 }
 0x845   :  { %v1278_v35 = vmul.f32 %v1272_v34, %v2479_v51  ;;  %v1277_v15 = vmul.f32 0.5, %v1276_v6 }
 0x847   :  { %v1280_v36 = vadd.f32 %v1279_v22, %v1278_v35 }
 0x849   :  { %1818 = vtanh.f32 %v1280_v36 }
 0x850   :  { %v1668_v2 = vpop.f32.mrb[28].mxu0 }
 0x851   :  { %v2496_v8 = vadd.f32 %v1668_v2, %v1629_v7  ;;  %v1401_v9 = vpop.f32.mrb[29].mxu0 }
 0x852   :  { %v2498_v10 = vadd.f32 %v1629_v7, %v1401_v9  ;;  %v1669_v11 = vpop.f32.mrb[30].mxu0 }
 0x853   :  { %v1819_v13 = vpop.eup %1818  ;;  %1436 = vmax.xlane.f32.xlu1 %v2496_v8  ;;  %v1404_v14 = vpop.f32.mrb[31].mxu0  ;;  %v2502_v56 = vadd.f32 %v1669_v11, %v1629_v7 }
 0x854   :  { %1432 = vmax.xlane.f32.xlu0 %v2498_v10  ;;  %v1282_v16 = vmul.f32 %v1819_v13, %v1277_v15  ;;  %v2504_v45 = vadd.f32 %v1629_v7, %v1404_v14 }
 0x856   :  { %v1295_v46 = vpack.c.bf16 %v1282_v16, %v2482_v58 }
 0x857   :  { %1438 = vmax.xlane.f32.xlu1 %v2502_v56 }
 0x858   :  { %1434 = vmax.xlane.f32.xlu0 %v2504_v45  ;;  %1671 = vmatmul.mubr.bf16.gmra.mrb[32].mxu0 %v1295_v46 }
 0x8e0   :  { %v2511_v49 = vpop.xlane.xlu1 %1436 }
 0x8e1   :  { %v2509_v48 = vpop.xlane.xlu0 %1432  ;;  %v1450_v55 = vsub.f32 %v2496_v8, %v2511_v49 }
 0x8e2   :  { %v1448_v51 = vsub.f32 %v2498_v10, %v2509_v48 }
 0x8e3   :  { %v1460_v47 = vmul.f32 1.442695, %v1450_v55 }
 0x8e4   :  { %v2519_v38 = vpop.xlane.xlu1 %1438  ;;  %v1456_v57 = vmul.f32 1.442695, %v1448_v51 }
 0x8e5   :  { %v2513_v50 = vpop.xlane.xlu0 %1434  ;;  %v1451_v58 = vsub.f32 %v2502_v56, %v2519_v38 }
 0x8e6   :  { %v1449_v53 = vsub.f32 %v2504_v45, %v2513_v50  ;;  %1820 = vpow2.f32 %v1456_v57 }
 0x8e7   :  { %v1462_v12 = vmul.f32 1.442695, %v1451_v58 }
 0x8e8   :  { %v1458_v59 = vmul.f32 1.442695, %v1449_v53 }
 0x8ea   :  { %1822 = vpow2.f32 %v1458_v59 }
 0x8eb   :  { %1824 = vpow2.f32 %v1460_v47 }
 0x8ec   :  { %1826 = vpow2.f32 %v1462_v12 }
 0x8f0   :  { %v1821_v41 = vpop.eup %1820 }
 0x8f4   :  { %v1823_v0 = vpop.eup %1822 }
 0x8f5   :  { %v1825_v44 = vpop.eup %1824 }
 0x8f6   :  { %v1827_v18 = vpop.eup %1826 }
 0x92b   :  { %v1672_v62 = vpop.f32.mrb[32].mxu0 }
 0x92c   :  { %v1417_v54 = vpop.f32.mrb[33].mxu0  ;;  %v2530_v52 = vadd.f32 %v1672_v62, %v1629_v7 }
 0x92d   :  { %v2525_v63 = vadd.f32 %v1629_v7, %v1417_v54  ;;  %v1673_v1 = vpop.f32.mrb[34].mxu0 }
 0x92e   :  { %v1420_v19 = vpop.f32.mrb[35].mxu0  ;;  %v2533_v39 = vadd.f32 %v1673_v1, %v1629_v7 }
 0x92f   :  { %v2527_v43 = vadd.f32 %v1629_v7, %v1420_v19  ;;  %1440 = vmax.xlane.f32.xlu0 %v2525_v63 }
 0x931   :  { %1442 = vmax.xlane.f32.xlu1 %v2527_v43 }
 0x933   :  { %1444 = vmax.xlane.f32.xlu0 %v2530_v52 }
 0x935   :  { %1446 = vmax.xlane.f32.xlu1 %v2533_v39 }
 0x937   :  { %1472 = vadd.xlane.f32.xlu0 %v1821_v41 }
 0x939   :  { %1474 = vadd.xlane.f32.xlu1 %v1823_v0 }
 0x93b   :  { %1476 = vadd.xlane.f32.xlu0 %v1825_v44 }
 0x93d   :  { %1478 = vadd.xlane.f32.xlu1 %v1827_v18 }
 0x9bc   :  { %v2537_v3 = vpop.xlane.xlu0 %1440 }
 0x9bd   :  { %v1452_v4 = vsub.f32 %v2525_v63, %v2537_v3 }
 0x9be   :  { %v2541_v23 = vpop.xlane.xlu1 %1442 }
 0x9bf   :  { %v1464_v24 = vmul.f32 1.442695, %v1452_v4  ;;  %v1453_v5 = vsub.f32 %v2527_v43, %v2541_v23 }
 0x9c0   :  { %v2545_v25 = vpop.xlane.xlu0 %1444 }
 0x9c1   :  { %1828 = vpow2.f32 %v1464_v24  ;;  %v1466_v26 = vmul.f32 1.442695, %v1453_v5  ;;  %v1454_v27 = vsub.f32 %v2530_v52, %v2545_v25 }
 0x9c2   :  { %v2549_v30 = vpop.xlane.xlu1 %1446 }
 0x9c3   :  { %1830 = vpow2.f32 %v1466_v26  ;;  %v1468_v28 = vmul.f32 1.442695, %v1454_v27  ;;  %v1455_v61 = vsub.f32 %v2533_v39, %v2549_v30 }
 0x9c4   :  { %v1473_v42 = vpop.xlane.xlu0 %1472 }
 0x9c5   :  { %1832 = vpow2.f32 %v1468_v28  ;;  %v1470_v40 = vmul.f32 1.442695, %v1455_v61 }
 0x9c6   :  { %1834 = vlog2.f32 %v1473_v42  ;;  %v1475_v60 = vpop.xlane.xlu1 %1474 }
 0x9c7   :  { %1836 = vpow2.f32 %v1470_v40 }
 0x9c8   :  { %1838 = vlog2.f32 %v1475_v60  ;;  %v1477_v29 = vpop.xlane.xlu0 %1476 }
 0x9c9   :  { %1840 = vlog2.f32 %v1477_v29 }
 0x9ca   :  { %v1479_v17 = vpop.xlane.xlu1 %1478 }
 0x9cb   :  { %v1829_v31 = vpop.eup %1828  ;;  %1842 = vlog2.f32 %v1479_v17 }
 0x9cc   :  { %1480 = vadd.xlane.f32.xlu0 %v1829_v31 }
 0x9cd   :  { %v1831_v20 = vpop.eup %1830 }
 0x9ce   :  { %1482 = vadd.xlane.f32.xlu1 %v1831_v20 }
 0x9cf   :  { %v1833_v21 = vpop.eup %1832 }
 0x9d0   :  { %v1835_v32 = vpop.eup %1834  ;;  %1484 = vadd.xlane.f32.xlu0 %v1833_v21 }
 0x9d1   :  { %v1837_v33 = vpop.eup %1836  ;;  %v1489_v34 = vmul.f32 0.6931472, %v1835_v32 }
 0x9d2   :  { %v1839_v22 = vpop.eup %1838  ;;  %1486 = vadd.xlane.f32.xlu1 %v1837_v33 }
 0x9d3   :  { %v1841_v35 = vpop.eup %1840  ;;  %v1504_v36 = vadd.f32 %v1489_v34, %v2509_v48  ;;  %v1491_v37 = vmul.f32 0.6931472, %v1839_v22 }
 0x9d4   :  { %v1493_v6 = vmul.f32 0.6931472, %v1841_v35 }
 0x9d5   :  { %v1843_v7 = vpop.eup %1842  ;;  %v1512_v2 = vsub.f32 %v2498_v10, %v1504_v36  ;;  %v1505_v9 = vadd.f32 %v1491_v37, %v2513_v50 }
 0x9d6   :  { %v1506_v15 = vadd.f32 %v1493_v6, %v2511_v49  ;;  %v1495_v11 = vmul.f32 0.6931472, %v1843_v7 }
 0x9d7   :  { %1520 = vst [vmem:[%s2598_s5] sm:$0xff] %v1512_v2  ;;  %v1513_v13 = vsub.f32 %v2504_v45, %v1505_v9 }
 0x9d8   :  { %v1514_v14 = vsub.f32 %v2496_v8, %v1506_v15  ;;  %v1507_v16 = vadd.f32 %v1495_v11, %v2519_v38 }
 0x9d9   :  { %1521 = vst [vmem:[%s2598_s5 + $0x8] sm:$0xff] %v1513_v13 }
 0x9da   :  { %1522 = vst [vmem:[%s2598_s5 + $0x10] sm:$0xff] %v1514_v14  ;;  %v1515_v10 = vsub.f32 %v2502_v56, %v1507_v16 }
 0x9dc   :  { %1523 = vst [vmem:[%s2598_s5 + $0x18] sm:$0xff] %v1515_v10 }
 0xa59   :  { %v1481_v46 = vpop.xlane.xlu0 %1480 }
 0xa5a   :  { %1844 = vlog2.f32 %v1481_v46 }
 0xa5b   :  { %v1483_v45 = vpop.xlane.xlu1 %1482 }
 0xa5c   :  { %1846 = vlog2.f32 %v1483_v45 }
 0xa5d   :  { %v1485_v8 = vpop.xlane.xlu0 %1484 }
 0xa5e   :  { %1848 = vlog2.f32 %v1485_v8 }
 0xa5f   :  { %v1487_v48 = vpop.xlane.xlu1 %1486 }
 0xa60   :  { %1850 = vlog2.f32 %v1487_v48 }
 0xa64   :  { %v1845_v49 = vpop.eup %1844 }
 0xa65   :  { %v1497_v50 = vmul.f32 0.6931472, %v1845_v49 }
 0xa66   :  { %v1847_v51 = vpop.eup %1846 }
 0xa67   :  { %v1508_v53 = vadd.f32 %v1497_v50, %v2537_v3  ;;  %v1499_v38 = vmul.f32 0.6931472, %v1847_v51 }
 0xa68   :  { %v1849_v55 = vpop.eup %1848 }
 0xa69   :  { %v1516_v56 = vsub.f32 %v2525_v63, %v1508_v53  ;;  %v1509_v57 = vadd.f32 %v1499_v38, %v2541_v23  ;;  %v1501_v58 = vmul.f32 0.6931472, %v1849_v55 }
 0xa6a   :  { %v1851_v59 = vpop.eup %1850 }
 0xa6b   :  { %1524 = vst [vmem:[%s2598_s5 + $0x20] sm:$0xff] %v1516_v56  ;;  %v1517_v62 = vsub.f32 %v2527_v43, %v1509_v57  ;;  %v1510_v47 = vadd.f32 %v1501_v58, %v2545_v25  ;;  %v1503_v54 = vmul.f32 0.6931472, %v1851_v59 }
 0xa6d   :  { %1525 = vst [vmem:[%s2598_s5 + $0x28] sm:$0xff] %v1517_v62  ;;  %v1518_v1 = vsub.f32 %v2530_v52, %v1510_v47  ;;  %v1511_v63 = vadd.f32 %v1503_v54, %v2549_v30 }
 0xa6f   :  { %1526 = vst [vmem:[%s2598_s5 + $0x30] sm:$0xff] %v1518_v1  ;;  %v1519_v12 = vsub.f32 %v2533_v39, %v1511_v63 }
 0xa71   :  { %1527 = vst [vmem:[%s2598_s5 + $0x38] sm:$0xff] %v1519_v12 }
 0xa72   :  { %1532 = vsyncpa [#allocation7], 1 }
 0xa73   :  { %1533 = vsyncpa [#allocation9], 1 }

</bundles_post_ra>
